<compile_context>
chip_gen: v6e
topology: v6e:2x2x1
jax: 0.10.0
libtpu: 0.0.40
codegen_flags: <defaults>
</compile_context>

<pallas_src>
import math

import jax
import jax.numpy as jnp
import numpy as np
from jax import lax
from jax.experimental import pallas as pl
from jax.experimental.pallas import tpu as pltpu

_LN_EPS = 1e-5  # torch.nn.LayerNorm default

# Records the exception if the Buffered(1) weight path was rejected and the
# double-buffered fallback was used (None == single-buffered path succeeded).
_weight_buffering_fallback = None


def _layernorm_f32(z, g_ref, b_ref):
    """LayerNorm with one-pass moments; stats and output in f32."""
    zf = z.astype(jnp.float32)
    mu = jnp.mean(zf, axis=-1, keepdims=True)
    m2 = jnp.mean(zf * zf, axis=-1, keepdims=True)
    var = jnp.maximum(m2 - mu * mu, 0.0)
    zn = (zf - mu) * lax.rsqrt(var + _LN_EPS)
    return zn * g_ref[...].astype(jnp.float32) + b_ref[...].astype(jnp.float32)


def _perceiver_ca_kernel(x_ref, lat_ref,
                         g1_ref, b1_ref, g2_ref, b2_ref,
                         wq_ref, wk_ref, wv_ref, wout_ref,
                         o_ref,
                         q_sc, m_sc, l_sc, acc_sc):
    """One grid step = G (b,t) slices x one A tile, flash-softmax over A."""
    j = pl.program_id(1)
    nj = pl.num_programs(1)
    G, TA, D = x_ref.shape
    L = lat_ref.shape[1]
    inner = wq_ref.shape[1]
    cdt = wq_ref.dtype               # MXU operand dtype (bf16 in production)
    scale = 1.0 / math.sqrt(inner)   # dim_head ** -0.5

    @pl.when(j == 0)
    def _init():
        # q projection once per (b,t) slice group; fold attention scale in
        # here (cheaper than scaling the (L, A) score matrix every A tile).
        ln = _layernorm_f32(lat_ref[...], g2_ref, b2_ref).astype(cdt)
        q = jnp.dot(ln.reshape(G * L, D), wq_ref[...],
                    preferred_element_type=jnp.float32)
        q_sc[...] = (q * scale).astype(cdt).reshape(G, L, inner)
        m_sc[...] = jnp.full_like(m_sc, -jnp.inf)
        l_sc[...] = jnp.zeros_like(l_sc)
        acc_sc[...] = jnp.zeros_like(acc_sc)

    # LayerNorm + k/v projections for this A tile only (bounds the f32
    # working set to one tile).  Split dots: no (tokens, 2*inner) f32 buffer.
    xn = _layernorm_f32(x_ref[...], g1_ref, b1_ref).astype(cdt)   # (G,TA,D)
    xn2 = xn.reshape(G * TA, D)
    k = jnp.dot(xn2, wk_ref[...],
                preferred_element_type=jnp.float32).astype(cdt).reshape(G, TA, inner)
    v = jnp.dot(xn2, wv_ref[...],
                preferred_element_type=jnp.float32).astype(cdt).reshape(G, TA, inner)

    # q·kᵀ contracting last dims (no explicit k.T).
    # TODO(synk): confirm via pl.lower_as_mlir that Mosaic does not insert an
    # XLU relayout of k for this NT contraction on the production JAX build.
    s = lax.dot_general(q_sc[...], k,
                        dimension_numbers=(((2,), (2,)), ((0,), (0,))),
                        preferred_element_type=jnp.float32)        # (G,L,TA)

    # Online (flash) softmax update.
    m_prev = m_sc[...]
    m_new = jnp.maximum(m_prev, jnp.max(s, axis=-1, keepdims=True))
    alpha = jnp.exp(m_prev - m_new)
    p = jnp.exp(s - m_new)
    l_sc[...] = alpha * l_sc[...] + jnp.sum(p, axis=-1, keepdims=True)
    acc_sc[...] = alpha * acc_sc[...] + lax.dot_general(
        p.astype(cdt), v,
        dimension_numbers=(((2,), (1,)), ((0,), (0,))),
        preferred_element_type=jnp.float32)                        # (G,L,inner)
    m_sc[...] = m_new

    @pl.when(j == nj - 1)
    def _finalize():
        attn = acc_sc[...] * pl.reciprocal(l_sc[...], approx=True)
        out = jnp.dot(attn.reshape(G * L, inner).astype(cdt), wout_ref[...],
                      preferred_element_type=jnp.float32)
        o_ref[...] = out.reshape(G, L, D).astype(o_ref.dtype)


def _vmem_capacity_bytes():
    """Physical per-core VMEM; conservative 64 MiB (v7x) if query fails."""
    try:
        info = pltpu.get_tpu_info()
        cap = int(getattr(info, "vmem_capacity_bytes", 0))
        if cap > 0:
            return cap
    except Exception:
        pass
    return 64 << 20


def _step_vmem_bytes(g, ta, L, D, inner, act_isz, w_isz):
    """Conservative per-grid-step VMEM estimate (buffers + f32 intermediates)."""
    io = 2 * g * ta * D * act_isz               # x tile, double-buffered
    io += 4 * g * L * D * act_isz               # latents + out, double-buffered
    scr = g * L * (inner * (w_isz + 4) + 8)     # q_sc, acc_sc, m, l scratch
    tmp = g * ta * (D + 2 * inner) * (4 + w_isz)   # xn / k / v f32 + cast copies
    tmp += 2 * g * L * ta * 4                      # s and p (f32)
    tmp += g * L * (D + inner) * 4                 # j==0 branch: ln_f32, q_f32
    return io + scr + tmp


def _select_blocks(BT, A, L, D, inner, act_isz, w_isz, vmem_cap):
    """Pick (g_block, a_block) to fit VMEM, fill the MXU M-dim and keep an
    even, >= 2 step count along the parallel (megacore) grid axis."""
    sub = 16 if act_isz <= 2 else 8
    bt_divs = [g for g in range(1, BT + 1) if BT % g == 0]
    a_cands = sorted({A} | {t for t in range(sub, A, sub) if A % t == 0},
                     reverse=True)

    w_resident = (4 * D * inner) * w_isz + 4 * D * 4   # wq/wk/wv/wout + LN params
    avail = int(0.85 * vmem_cap) - w_resident

    best = None
    for g in bt_divs:
        fitting = [ta for ta in a_cands
                   if _step_vmem_bytes(g, ta, L, D, inner, act_isz, w_isz) <= avail]
        if not fitting:
            continue
        ta = fitting[0]                 # largest A tile that fits
        steps_i = BT // g
        score = (steps_i >= 2,          # both v7x TensorCores get work
                 g * L >= 256,          # fill MXU M-dim on q / out projections
                 steps_i % 2 == 0,      # even split across 2 cores
                 g * ta,                # per-step work (amortize ~0.35us/step)
                 g)
        if best is None or score > best[0]:
            best = (score, g, ta)
    if best is None:
        return 1, min(a_cands)
    return best[1], best[2]


def perceiver_attention_ca(x, latents, params, *, g_block=None, a_block=None,
                           single_buffer_weights=True):
    """Pallas implementation of HunyuanPerceiverAttentionCA.forward.

    Production note (v5e especially): pass bf16 weights/activations — the MXU
    runs f32 at a fraction of its bf16 rate.  The f32 path is for testing.
    """
    global _weight_buffering_fallback
    B, T, A, D = x.shape
    _, _, L, Dl = latents.shape
    assert Dl == D
    wq, wkv, wout = params["wq"], params["wkv"], params["wout"]
    inner = wq.shape[1]
    assert wkv.shape == (D, 2 * inner) and wout.shape == (inner, D)
    # Split the fused kv weight so the kernel runs two (D, inner) dots.
    wk = wkv[:, :inner]
    wv = wkv[:, inner:]

    BT = B * T
    xf = x.reshape(BT, A, D)
    lf = latents.reshape(BT, L, D)
    g1 = params["ln1_g"].reshape(1, D)
    b1 = params["ln1_b"].reshape(1, D)
    g2 = params["ln2_g"].reshape(1, D)
    b2 = params["ln2_b"].reshape(1, D)

    vmem_cap = _vmem_capacity_bytes()
    sel_g, sel_a = _select_blocks(BT, A, L, D, inner,
                                  x.dtype.itemsize, wq.dtype.itemsize, vmem_cap)
    if g_block is None:
        g_block = sel_g
    if a_block is None:
        a_block = sel_a
    assert BT % g_block == 0 and A % a_block == 0
    grid = (BT // g_block, A // a_block)

    w_bytes = sum(int(w.size) * w.dtype.itemsize for w in (wq, wk, wv, wout))
    need = ((1 if single_buffer_weights else 2) * w_bytes
            + _step_vmem_bytes(g_block, a_block, L, D, inner,
                               x.dtype.itemsize, wq.dtype.itemsize))
    # Clamp to physical VMEM (~56 MiB on v7x, ~110 MiB on v5e/v6e).
    vmem_limit = int(min(int(0.88 * vmem_cap), max(32 << 20, int(1.25 * need))))

    flops = 2 * BT * (L * D * inner          # q projection
                      + A * D * 2 * inner    # k + v projections
                      + 2 * L * A * inner    # q.kT and p.v
                      + L * inner * D)       # output projection
    out_bytes = BT * L * D * x.dtype.itemsize
    cost = pl.CostEstimate(
        flops=int(flops),
        transcendentals=int(BT * (L * A + L * grid[1] + A + L)),
        bytes_accessed=int(xf.size * xf.dtype.itemsize
                           + lf.size * lf.dtype.itemsize
                           + out_bytes + w_bytes))

    def build(weight_mode):
        def wspec(shape):
            nd = len(shape)
            kwargs = {} if weight_mode is None else {"pipeline_mode": weight_mode}
            return pl.BlockSpec(shape, lambda i, j, _n=nd: (0,) * _n, **kwargs)

        in_specs = [
            pl.BlockSpec((g_block, a_block, D), lambda i, j: (i, j, 0)),  # x tiles
            pl.BlockSpec((g_block, L, D), lambda i, j: (i, 0, 0)),        # latents
            wspec((1, D)), wspec((1, D)),                                 # ln1 g/b
            wspec((1, D)), wspec((1, D)),                                 # ln2 g/b
            wspec((D, inner)),                                            # Wq
            wspec((D, inner)),                                            # Wk
            wspec((D, inner)),                                            # Wv
            wspec((inner, D)),                                            # Wout
        ]
        return pl.pallas_call(
            _perceiver_ca_kernel,
            out_shape=jax.ShapeDtypeStruct((BT, L, D), x.dtype),
            grid=grid,
            in_specs=in_specs,
            out_specs=pl.BlockSpec((g_block, L, D), lambda i, j: (i, 0, 0)),
            scratch_shapes=[
                pltpu.VMEM((g_block, L, inner), wq.dtype),    # q (pre-scaled)
                pltpu.VMEM((g_block, L, 1), jnp.float32),     # running max
                pltpu.VMEM((g_block, L, 1), jnp.float32),     # running sum
                pltpu.VMEM((g_block, L, inner), jnp.float32), # running acc
            ],
            compiler_params=pltpu.CompilerParams(
                dimension_semantics=("parallel", "arbitrary"),
                vmem_limit_bytes=vmem_limit),
            cost_estimate=cost,
        )

    args = (xf, lf, g1, b1, g2, b2, wq, wk, wv, wout)
    if single_buffer_weights:
        try:
            out = build(pl.Buffered(1))(*args)
            _weight_buffering_fallback = None
        except Exception as e:  # record instead of fully silent fallback
            # TODO(synk): once the production JAX build is pinned, surface this
            # (double-buffered weights cost ~24 MiB extra VMEM at D=3072).
            _weight_buffering_fallback = e
            out = build(None)(*args)
    else:
        out = build(None)(*args)
    return out.reshape(B, T, L, D)


def perceiver_attention_ca_ref(x, latents, params):
    """Pure-JAX (f32) reference mirroring the PyTorch forward."""
    def layernorm(z, g, b):
        mu = jnp.mean(z, axis=-1, keepdims=True)
        var = jnp.mean((z - mu) ** 2, axis=-1, keepdims=True)
        return (z - mu) / jnp.sqrt(var + _LN_EPS) * g + b

    xn = layernorm(x, params["ln1_g"], params["ln1_b"])
    ln = layernorm(latents, params["ln2_g"], params["ln2_b"])
    q = ln @ params["wq"]
    kv = xn @ params["wkv"]
    inner = params["wq"].shape[1]
    k, v = kv[..., :inner], kv[..., inner:]
    s = jnp.einsum("btld,btad->btla", q, k) / math.sqrt(inner)
    p = jax.nn.softmax(s, axis=-1)
    o = jnp.einsum("btla,btad->btld", p, v)
    return o @ params["wout"]


def init_params(key, dim, dim_head):
    """Deterministic parameter init (shapes follow the module __init__)."""
    k1, k2, k3 = jax.random.split(key, 3)
    sc = 1.0 / math.sqrt(dim)
    return {
        "ln1_g": jnp.ones((dim,), jnp.float32),
        "ln1_b": jnp.zeros((dim,), jnp.float32),
        "ln2_g": jnp.ones((dim,), jnp.float32),
        "ln2_b": jnp.zeros((dim,), jnp.float32),
        # stored as (in, out) == transpose of nn.Linear's (out, in)
        "wq": jax.random.normal(k1, (dim, dim_head), jnp.float32) * sc,
        "wkv": jax.random.normal(k2, (dim, 2 * dim_head), jnp.float32) * sc,
        # NOTE: PyTorch zero-inits to_out; use small random values so the
        # end-to-end correctness check is non-trivial.
        "wout": (jax.random.normal(k3, (dim_head, dim), jnp.float32)
                 / math.sqrt(dim_head)),
    }


if __name__ == "__main__":
    # Small shapes consistent with forward(): x (b,t,aa,D), latents (b,t,hw,D)
    B, T, A, L = 2, 2, 16, 8
    DIM, DIM_HEAD = 32, 16   # original: dim=3072, dim_head=1024 (heads unused)

    key = jax.random.PRNGKey(0)
    kx, kl, kp = jax.random.split(key, 3)
    x = jax.random.normal(kx, (B, T, A, DIM), jnp.float32)
    latents = jax.random.normal(kl, (B, T, L, DIM), jnp.float32)
    params = init_params(kp, DIM, DIM_HEAD)

    ref = perceiver_attention_ca_ref(x, latents, params)

    # f32 path, default block selection (single A tile).
    out = jax.block_until_ready(perceiver_attention_ca(x, latents, params))
    np.testing.assert_allclose(np.asarray(out), np.asarray(ref),
                               rtol=5e-3, atol=5e-3)
    assert out.shape == (B, T, L, DIM)

    # Exercise the online-softmax multi-tile path (A split into two tiles).
    out2 = jax.block_until_ready(
        perceiver_attention_ca(x, latents, params, g_block=2, a_block=8))
    np.testing.assert_allclose(np.asarray(out2), np.asarray(ref),
                               rtol=5e-3, atol=5e-3)

    # bf16 path — intended production config (bf16 operands into the MXU,
    # f32 accumulation); looser tolerance vs the f32 reference.
    xb = x.astype(jnp.bfloat16)
    lb = latents.astype(jnp.bfloat16)
    pb = {k: (v.astype(jnp.bfloat16) if k in ("wq", "wkv", "wout") else v)
          for k, v in params.items()}
    outb = jax.block_until_ready(perceiver_attention_ca(xb, lb, pb))
    np.testing.assert_allclose(np.asarray(outb.astype(jnp.float32)),
                               np.asarray(ref), rtol=8e-2, atol=8e-2)

    print("KERNEL_OK")
</pallas_src>

<mosaic_0001>
module attributes {stable_mosaic.version = 11 : i64} {
  func.func @_perceiver_ca_kernel(%arg0: i32, %arg1: i32, %arg2: memref<2x16x32xf32, #tpu.memory_space<vmem>>, %arg3: memref<2x8x32xf32, #tpu.memory_space<vmem>>, %arg4: memref<1x32xf32, #tpu.memory_space<vmem>>, %arg5: memref<1x32xf32, #tpu.memory_space<vmem>>, %arg6: memref<1x32xf32, #tpu.memory_space<vmem>>, %arg7: memref<1x32xf32, #tpu.memory_space<vmem>>, %arg8: memref<32x16xf32, #tpu.memory_space<vmem>>, %arg9: memref<32x16xf32, #tpu.memory_space<vmem>>, %arg10: memref<32x16xf32, #tpu.memory_space<vmem>>, %arg11: memref<16x32xf32, #tpu.memory_space<vmem>>, %arg12: memref<2x8x32xf32, #tpu.memory_space<vmem>>, %arg13: memref<2x8x16xf32, #tpu.memory_space<vmem>>, %arg14: memref<2x8x1xf32, #tpu.memory_space<vmem>>, %arg15: memref<2x8x1xf32, #tpu.memory_space<vmem>>, %arg16: memref<2x8x16xf32, #tpu.memory_space<vmem>>) attributes {dimension_semantics = [#tpu.dimension_semantics<parallel>, #tpu.dimension_semantics<arbitrary>], iteration_bounds = array<i64: 2, 1>, scalar_prefetch = 0 : i64, scratch_operands = 4 : i64, tpu.core_type = #tpu.core_type<tc>, window_params = [{transform_indices = @transform_0, window_bounds = array<i64: 2, 16, 32>}, {transform_indices = @transform_1, window_bounds = array<i64: 2, 8, 32>}, {pipeline_mode = #tpu.pipeline_mode<synchronous>, transform_indices = @transform_2, window_bounds = array<i64: 1, 32>}, {pipeline_mode = #tpu.pipeline_mode<synchronous>, transform_indices = @transform_3, window_bounds = array<i64: 1, 32>}, {pipeline_mode = #tpu.pipeline_mode<synchronous>, transform_indices = @transform_4, window_bounds = array<i64: 1, 32>}, {pipeline_mode = #tpu.pipeline_mode<synchronous>, transform_indices = @transform_5, window_bounds = array<i64: 1, 32>}, {pipeline_mode = #tpu.pipeline_mode<synchronous>, transform_indices = @transform_6, window_bounds = array<i64: 32, 16>}, {pipeline_mode = #tpu.pipeline_mode<synchronous>, transform_indices = @transform_7, window_bounds = array<i64: 32, 16>}, {pipeline_mode = #tpu.pipeline_mode<synchronous>, transform_indices = @transform_8, window_bounds = array<i64: 32, 16>}, {pipeline_mode = #tpu.pipeline_mode<synchronous>, transform_indices = @transform_9, window_bounds = array<i64: 16, 32>}, {transform_indices = @transform_10, window_bounds = array<i64: 2, 8, 32>}]} {
    %c0_i32 = arith.constant 0 : i32
    %0 = arith.cmpi eq, %arg1, %c0_i32 : i32
    %1 = arith.extui %0 : i1 to i32
    %c0_i32_0 = arith.constant 0 : i32
    %2 = arith.cmpi ne, %1, %c0_i32_0 : i32
    scf.if %2 {
      %c0_45 = arith.constant 0 : index
      %c0_46 = arith.constant 0 : index
      %c0_47 = arith.constant 0 : index
      %66 = vector.load %arg3[%c0_45, %c0_46, %c0_47] : memref<2x8x32xf32, #tpu.memory_space<vmem>>, vector<2x8x32xf32>
      %cst_48 = arith.constant dense<0.000000e+00> : vector<2x8xf32>
      %67 = vector.multi_reduction <add>, %66, %cst_48 [2] : vector<2x8x32xf32> to vector<2x8xf32>
      %68 = vector.shape_cast %67 : vector<2x8xf32> to vector<2x8x1xf32>
      %cst_49 = arith.constant 3.200000e+01 : f32
      %69 = vector.broadcast %cst_49 : f32 to vector<2x8x1xf32>
      %70 = arith.divf %68, %69 : vector<2x8x1xf32>
      %71 = arith.mulf %66, %66 : vector<2x8x32xf32>
      %cst_50 = arith.constant dense<0.000000e+00> : vector<2x8xf32>
      %72 = vector.multi_reduction <add>, %71, %cst_50 [2] : vector<2x8x32xf32> to vector<2x8xf32>
      %73 = vector.shape_cast %72 : vector<2x8xf32> to vector<2x8x1xf32>
      %cst_51 = arith.constant 3.200000e+01 : f32
      %74 = vector.broadcast %cst_51 : f32 to vector<2x8x1xf32>
      %75 = arith.divf %73, %74 : vector<2x8x1xf32>
      %76 = arith.mulf %70, %70 : vector<2x8x1xf32>
      %77 = arith.subf %75, %76 : vector<2x8x1xf32>
      %cst_52 = arith.constant 0.000000e+00 : f32
      %78 = vector.broadcast %cst_52 : f32 to vector<2x8x1xf32>
      %79 = arith.maximumf %77, %78 : vector<2x8x1xf32>
      %80 = vector.broadcast %70 : vector<2x8x1xf32> to vector<2x8x32xf32>
      %81 = arith.subf %66, %80 : vector<2x8x32xf32>
      %cst_53 = arith.constant 9.99999974E-6 : f32
      %82 = vector.broadcast %cst_53 : f32 to vector<2x8x1xf32>
      %83 = arith.addf %79, %82 : vector<2x8x1xf32>
      %84 = math.rsqrt %83 : vector<2x8x1xf32>
      %85 = vector.broadcast %84 : vector<2x8x1xf32> to vector<2x8x32xf32>
      %86 = arith.mulf %81, %85 : vector<2x8x32xf32>
      %c0_54 = arith.constant 0 : index
      %c0_55 = arith.constant 0 : index
      %87 = vector.load %arg6[%c0_54, %c0_55] : memref<1x32xf32, #tpu.memory_space<vmem>>, vector<1x32xf32>
      %88 = vector.shape_cast %87 : vector<1x32xf32> to vector<1x1x32xf32>
      %89 = vector.broadcast %88 : vector<1x1x32xf32> to vector<2x8x32xf32>
      %90 = arith.mulf %86, %89 : vector<2x8x32xf32>
      %c0_56 = arith.constant 0 : index
      %c0_57 = arith.constant 0 : index
      %91 = vector.load %arg7[%c0_56, %c0_57] : memref<1x32xf32, #tpu.memory_space<vmem>>, vector<1x32xf32>
      %92 = vector.shape_cast %91 : vector<1x32xf32> to vector<1x1x32xf32>
      %93 = vector.broadcast %92 : vector<1x1x32xf32> to vector<2x8x32xf32>
      %94 = arith.addf %90, %93 : vector<2x8x32xf32>
      %95 = vector.shape_cast %94 : vector<2x8x32xf32> to vector<16x32xf32>
      %c0_58 = arith.constant 0 : index
      %c0_59 = arith.constant 0 : index
      %96 = vector.load %arg8[%c0_58, %c0_59] : memref<32x16xf32, #tpu.memory_space<vmem>>, vector<32x16xf32>
      %cst_60 = arith.constant dense<0.000000e+00> : vector<16x16xf32>
      %97 = tpu.matmul %95, %96, %cst_60 {dimension_numbers = #tpu.dot_dimension_numbers<[1], [0], [0], [1], [0, 0, 1, 1], [], []>} : vector<16x32xf32>, vector<32x16xf32>, vector<16x16xf32> -> vector<16x16xf32>
      %cst_61 = arith.constant 2.500000e-01 : f32
      %98 = vector.broadcast %cst_61 : f32 to vector<16x16xf32>
      %99 = arith.mulf %97, %98 : vector<16x16xf32>
      %100 = vector.shape_cast %99 : vector<16x16xf32> to vector<2x8x16xf32>
      %c0_62 = arith.constant 0 : index
      %c0_63 = arith.constant 0 : index
      %c0_64 = arith.constant 0 : index
      %101 = vector.load %arg13[%c0_62, %c0_63, %c0_64] : memref<2x8x16xf32, #tpu.memory_space<vmem>>, vector<2x8x16xf32>
      tpu.vector_store %arg13[%c0_62, %c0_63, %c0_64], %100 {strides = array<i32>} : memref<2x8x16xf32, #tpu.memory_space<vmem>>, vector<2x8x16xf32>,
      %cst_65 = arith.constant 0xFF800000 : f32
      %102 = vector.broadcast %cst_65 : f32 to vector<2x8x1xf32>
      %c0_66 = arith.constant 0 : index
      %c0_67 = arith.constant 0 : index
      %c0_68 = arith.constant 0 : index
      %103 = vector.load %arg14[%c0_66, %c0_67, %c0_68] : memref<2x8x1xf32, #tpu.memory_space<vmem>>, vector<2x8x1xf32>
      tpu.vector_store %arg14[%c0_66, %c0_67, %c0_68], %102 {strides = array<i32>} : memref<2x8x1xf32, #tpu.memory_space<vmem>>, vector<2x8x1xf32>,
      %cst_69 = arith.constant 0.000000e+00 : f32
      %104 = vector.broadcast %cst_69 : f32 to vector<2x8x1xf32>
      %c0_70 = arith.constant 0 : index
      %c0_71 = arith.constant 0 : index
      %c0_72 = arith.constant 0 : index
      %105 = vector.load %arg15[%c0_70, %c0_71, %c0_72] : memref<2x8x1xf32, #tpu.memory_space<vmem>>, vector<2x8x1xf32>
      tpu.vector_store %arg15[%c0_70, %c0_71, %c0_72], %104 {strides = array<i32>} : memref<2x8x1xf32, #tpu.memory_space<vmem>>, vector<2x8x1xf32>,
      %cst_73 = arith.constant 0.000000e+00 : f32
      %106 = vector.broadcast %cst_73 : f32 to vector<2x8x16xf32>
      %c0_74 = arith.constant 0 : index
      %c0_75 = arith.constant 0 : index
      %c0_76 = arith.constant 0 : index
      %107 = vector.load %arg16[%c0_74, %c0_75, %c0_76] : memref<2x8x16xf32, #tpu.memory_space<vmem>>, vector<2x8x16xf32>
      tpu.vector_store %arg16[%c0_74, %c0_75, %c0_76], %106 {strides = array<i32>} : memref<2x8x16xf32, #tpu.memory_space<vmem>>, vector<2x8x16xf32>,
    } else {
    }
    %c0 = arith.constant 0 : index
    %c0_1 = arith.constant 0 : index
    %c0_2 = arith.constant 0 : index
    %3 = vector.load %arg2[%c0, %c0_1, %c0_2] : memref<2x16x32xf32, #tpu.memory_space<vmem>>, vector<2x16x32xf32>
    %cst = arith.constant dense<0.000000e+00> : vector<2x16xf32>
    %4 = vector.multi_reduction <add>, %3, %cst [2] : vector<2x16x32xf32> to vector<2x16xf32>
    %5 = vector.shape_cast %4 : vector<2x16xf32> to vector<2x16x1xf32>
    %cst_3 = arith.constant 3.200000e+01 : f32
    %6 = vector.broadcast %cst_3 : f32 to vector<2x16x1xf32>
    %7 = arith.divf %5, %6 : vector<2x16x1xf32>
    %8 = arith.mulf %3, %3 : vector<2x16x32xf32>
    %cst_4 = arith.constant dense<0.000000e+00> : vector<2x16xf32>
    %9 = vector.multi_reduction <add>, %8, %cst_4 [2] : vector<2x16x32xf32> to vector<2x16xf32>
    %10 = vector.shape_cast %9 : vector<2x16xf32> to vector<2x16x1xf32>
    %cst_5 = arith.constant 3.200000e+01 : f32
    %11 = vector.broadcast %cst_5 : f32 to vector<2x16x1xf32>
    %12 = arith.divf %10, %11 : vector<2x16x1xf32>
    %13 = arith.mulf %7, %7 : vector<2x16x1xf32>
    %14 = arith.subf %12, %13 : vector<2x16x1xf32>
    %cst_6 = arith.constant 0.000000e+00 : f32
    %15 = vector.broadcast %cst_6 : f32 to vector<2x16x1xf32>
    %16 = arith.maximumf %14, %15 : vector<2x16x1xf32>
    %17 = vector.broadcast %7 : vector<2x16x1xf32> to vector<2x16x32xf32>
    %18 = arith.subf %3, %17 : vector<2x16x32xf32>
    %cst_7 = arith.constant 9.99999974E-6 : f32
    %19 = vector.broadcast %cst_7 : f32 to vector<2x16x1xf32>
    %20 = arith.addf %16, %19 : vector<2x16x1xf32>
    %21 = math.rsqrt %20 : vector<2x16x1xf32>
    %22 = vector.broadcast %21 : vector<2x16x1xf32> to vector<2x16x32xf32>
    %23 = arith.mulf %18, %22 : vector<2x16x32xf32>
    %c0_8 = arith.constant 0 : index
    %c0_9 = arith.constant 0 : index
    %24 = vector.load %arg4[%c0_8, %c0_9] : memref<1x32xf32, #tpu.memory_space<vmem>>, vector<1x32xf32>
    %25 = vector.shape_cast %24 : vector<1x32xf32> to vector<1x1x32xf32>
    %26 = vector.broadcast %25 : vector<1x1x32xf32> to vector<2x16x32xf32>
    %27 = arith.mulf %23, %26 : vector<2x16x32xf32>
    %c0_10 = arith.constant 0 : index
    %c0_11 = arith.constant 0 : index
    %28 = vector.load %arg5[%c0_10, %c0_11] : memref<1x32xf32, #tpu.memory_space<vmem>>, vector<1x32xf32>
    %29 = vector.shape_cast %28 : vector<1x32xf32> to vector<1x1x32xf32>
    %30 = vector.broadcast %29 : vector<1x1x32xf32> to vector<2x16x32xf32>
    %31 = arith.addf %27, %30 : vector<2x16x32xf32>
    %32 = vector.shape_cast %31 : vector<2x16x32xf32> to vector<32x32xf32>
    %c0_12 = arith.constant 0 : index
    %c0_13 = arith.constant 0 : index
    %33 = vector.load %arg9[%c0_12, %c0_13] : memref<32x16xf32, #tpu.memory_space<vmem>>, vector<32x16xf32>
    %cst_14 = arith.constant dense<0.000000e+00> : vector<32x16xf32>
    %34 = tpu.matmul %32, %33, %cst_14 {dimension_numbers = #tpu.dot_dimension_numbers<[1], [0], [0], [1], [0, 0, 1, 1], [], []>} : vector<32x32xf32>, vector<32x16xf32>, vector<32x16xf32> -> vector<32x16xf32>
    %35 = vector.shape_cast %34 : vector<32x16xf32> to vector<2x16x16xf32>
    %c0_15 = arith.constant 0 : index
    %c0_16 = arith.constant 0 : index
    %36 = vector.load %arg10[%c0_15, %c0_16] : memref<32x16xf32, #tpu.memory_space<vmem>>, vector<32x16xf32>
    %cst_17 = arith.constant dense<0.000000e+00> : vector<32x16xf32>
    %37 = tpu.matmul %32, %36, %cst_17 {dimension_numbers = #tpu.dot_dimension_numbers<[1], [0], [0], [1], [0, 0, 1, 1], [], []>} : vector<32x32xf32>, vector<32x16xf32>, vector<32x16xf32> -> vector<32x16xf32>
    %38 = vector.shape_cast %37 : vector<32x16xf32> to vector<2x16x16xf32>
    %c0_18 = arith.constant 0 : index
    %c0_19 = arith.constant 0 : index
    %c0_20 = arith.constant 0 : index
    %39 = vector.load %arg13[%c0_18, %c0_19, %c0_20] : memref<2x8x16xf32, #tpu.memory_space<vmem>>, vector<2x8x16xf32>
    %cst_21 = arith.constant dense<0.000000e+00> : vector<2x8x16xf32>
    %40 = tpu.matmul %39, %35, %cst_21 {dimension_numbers = #tpu.dot_dimension_numbers<[2], [2], [1], [1], [0, 0, 0, 1, 1, 1], [0], [0]>} : vector<2x8x16xf32>, vector<2x16x16xf32>, vector<2x8x16xf32> -> vector<2x8x16xf32>
    %c0_22 = arith.constant 0 : index
    %c0_23 = arith.constant 0 : index
    %c0_24 = arith.constant 0 : index
    %41 = vector.load %arg14[%c0_22, %c0_23, %c0_24] : memref<2x8x1xf32, #tpu.memory_space<vmem>>, vector<2x8x1xf32>
    %cst_25 = arith.constant dense<0xFF800000> : vector<2x8xf32>
    %42 = vector.multi_reduction <maximumf>, %40, %cst_25 [2] : vector<2x8x16xf32> to vector<2x8xf32>
    %43 = vector.shape_cast %42 : vector<2x8xf32> to vector<2x8x1xf32>
    %44 = arith.maximumf %41, %43 : vector<2x8x1xf32>
    %45 = arith.subf %41, %44 : vector<2x8x1xf32>
    %46 = math.exp %45 : vector<2x8x1xf32>
    %47 = vector.broadcast %44 : vector<2x8x1xf32> to vector<2x8x16xf32>
    %48 = arith.subf %40, %47 : vector<2x8x16xf32>
    %49 = math.exp %48 : vector<2x8x16xf32>
    %c0_26 = arith.constant 0 : index
    %c0_27 = arith.constant 0 : index
    %c0_28 = arith.constant 0 : index
    %50 = vector.load %arg15[%c0_26, %c0_27, %c0_28] : memref<2x8x1xf32, #tpu.memory_space<vmem>>, vector<2x8x1xf32>
    %51 = arith.mulf %46, %50 : vector<2x8x1xf32>
    %cst_29 = arith.constant dense<0.000000e+00> : vector<2x8xf32>
    %52 = vector.multi_reduction <add>, %49, %cst_29 [2] : vector<2x8x16xf32> to vector<2x8xf32>
    %53 = vector.shape_cast %52 : vector<2x8xf32> to vector<2x8x1xf32>
    %54 = arith.addf %51, %53 : vector<2x8x1xf32>
    %c0_30 = arith.constant 0 : index
    %c0_31 = arith.constant 0 : index
    %c0_32 = arith.constant 0 : index
    %55 = vector.load %arg15[%c0_30, %c0_31, %c0_32] : memref<2x8x1xf32, #tpu.memory_space<vmem>>, vector<2x8x1xf32>
    tpu.vector_store %arg15[%c0_30, %c0_31, %c0_32], %54 {strides = array<i32>} : memref<2x8x1xf32, #tpu.memory_space<vmem>>, vector<2x8x1xf32>,
    %c0_33 = arith.constant 0 : index
    %c0_34 = arith.constant 0 : index
    %c0_35 = arith.constant 0 : index
    %56 = vector.load %arg16[%c0_33, %c0_34, %c0_35] : memref<2x8x16xf32, #tpu.memory_space<vmem>>, vector<2x8x16xf32>
    %57 = vector.broadcast %46 : vector<2x8x1xf32> to vector<2x8x16xf32>
    %58 = arith.mulf %57, %56 : vector<2x8x16xf32>
    %cst_36 = arith.constant dense<0.000000e+00> : vector<2x8x16xf32>
    %59 = tpu.matmul %49, %38, %cst_36 {dimension_numbers = #tpu.dot_dimension_numbers<[2], [1], [1], [2], [0, 0, 0, 1, 1, 2], [0], [0]>} : vector<2x8x16xf32>, vector<2x16x16xf32>, vector<2x8x16xf32> -> vector<2x8x16xf32>
    %60 = arith.addf %58, %59 : vector<2x8x16xf32>
    %c0_37 = arith.constant 0 : index
    %c0_38 = arith.constant 0 : index
    %c0_39 = arith.constant 0 : index
    %61 = vector.load %arg16[%c0_37, %c0_38, %c0_39] : memref<2x8x16xf32, #tpu.memory_space<vmem>>, vector<2x8x16xf32>
    tpu.vector_store %arg16[%c0_37, %c0_38, %c0_39], %60 {strides = array<i32>} : memref<2x8x16xf32, #tpu.memory_space<vmem>>, vector<2x8x16xf32>,
    %c0_40 = arith.constant 0 : index
    %c0_41 = arith.constant 0 : index
    %c0_42 = arith.constant 0 : index
    %62 = vector.load %arg14[%c0_40, %c0_41, %c0_42] : memref<2x8x1xf32, #tpu.memory_space<vmem>>, vector<2x8x1xf32>
    tpu.vector_store %arg14[%c0_40, %c0_41, %c0_42], %44 {strides = array<i32>} : memref<2x8x1xf32, #tpu.memory_space<vmem>>, vector<2x8x1xf32>,
    %c0_i32_43 = arith.constant 0 : i32
    %63 = arith.cmpi eq, %arg1, %c0_i32_43 : i32
    %64 = arith.extui %63 : i1 to i32
    %c0_i32_44 = arith.constant 0 : i32
    %65 = arith.cmpi ne, %64, %c0_i32_44 : i32
    scf.if %65 {
      %c0_45 = arith.constant 0 : index
      %c0_46 = arith.constant 0 : index
      %c0_47 = arith.constant 0 : index
      %66 = vector.load %arg16[%c0_45, %c0_46, %c0_47] : memref<2x8x16xf32, #tpu.memory_space<vmem>>, vector<2x8x16xf32>
      %c0_48 = arith.constant 0 : index
      %c0_49 = arith.constant 0 : index
      %c0_50 = arith.constant 0 : index
      %67 = vector.load %arg15[%c0_48, %c0_49, %c0_50] : memref<2x8x1xf32, #tpu.memory_space<vmem>>, vector<2x8x1xf32>
      %68 = tpu.reciprocal %67 {approx = true} : vector<2x8x1xf32> -> vector<2x8x1xf32>
      %69 = vector.broadcast %68 : vector<2x8x1xf32> to vector<2x8x16xf32>
      %70 = arith.mulf %66, %69 : vector<2x8x16xf32>
      %71 = vector.shape_cast %70 : vector<2x8x16xf32> to vector<16x16xf32>
      %c0_51 = arith.constant 0 : index
      %c0_52 = arith.constant 0 : index
      %72 = vector.load %arg11[%c0_51, %c0_52] : memref<16x32xf32, #tpu.memory_space<vmem>>, vector<16x32xf32>
      %cst_53 = arith.constant dense<0.000000e+00> : vector<16x32xf32>
      %73 = tpu.matmul %71, %72, %cst_53 {dimension_numbers = #tpu.dot_dimension_numbers<[1], [0], [0], [1], [0, 0, 1, 1], [], []>} : vector<16x16xf32>, vector<16x32xf32>, vector<16x32xf32> -> vector<16x32xf32>
      %74 = vector.shape_cast %73 : vector<16x32xf32> to vector<2x8x32xf32>
      %c0_54 = arith.constant 0 : index
      %c0_55 = arith.constant 0 : index
      %c0_56 = arith.constant 0 : index
      %75 = vector.load %arg12[%c0_54, %c0_55, %c0_56] : memref<2x8x32xf32, #tpu.memory_space<vmem>>, vector<2x8x32xf32>
      tpu.vector_store %arg12[%c0_54, %c0_55, %c0_56], %74 {strides = array<i32>} : memref<2x8x32xf32, #tpu.memory_space<vmem>>, vector<2x8x32xf32>,
    } else {
    }
    return
  }
  func.func @transform_0(%arg0: i32, %arg1: i32) -> (i32, i32, i32) {
    %c0_i32 = arith.constant 0 : i32
    %c0_i32_0 = arith.constant 0 : i32
    return %arg0, %arg1, %c0_i32 : i32, i32, i32
  }
  func.func @transform_1(%arg0: i32, %arg1: i32) -> (i32, i32, i32) {
    %c0_i32 = arith.constant 0 : i32
    %c0_i32_0 = arith.constant 0 : i32
    %c0_i32_1 = arith.constant 0 : i32
    return %arg0, %c0_i32, %c0_i32_0 : i32, i32, i32
  }
  func.func @transform_2(%arg0: i32, %arg1: i32) -> (i32, i32) {
    %c0_i32 = arith.constant 0 : i32
    %c0_i32_0 = arith.constant 0 : i32
    %c0_i32_1 = arith.constant 0 : i32
    return %c0_i32, %c0_i32_0 : i32, i32
  }
  func.func @transform_3(%arg0: i32, %arg1: i32) -> (i32, i32) {
    %c0_i32 = arith.constant 0 : i32
    %c0_i32_0 = arith.constant 0 : i32
    %c0_i32_1 = arith.constant 0 : i32
    return %c0_i32, %c0_i32_0 : i32, i32
  }
  func.func @transform_4(%arg0: i32, %arg1: i32) -> (i32, i32) {
    %c0_i32 = arith.constant 0 : i32
    %c0_i32_0 = arith.constant 0 : i32
    %c0_i32_1 = arith.constant 0 : i32
    return %c0_i32, %c0_i32_0 : i32, i32
  }
  func.func @transform_5(%arg0: i32, %arg1: i32) -> (i32, i32) {
    %c0_i32 = arith.constant 0 : i32
    %c0_i32_0 = arith.constant 0 : i32
    %c0_i32_1 = arith.constant 0 : i32
    return %c0_i32, %c0_i32_0 : i32, i32
  }
  func.func @transform_6(%arg0: i32, %arg1: i32) -> (i32, i32) {
    %c0_i32 = arith.constant 0 : i32
    %c0_i32_0 = arith.constant 0 : i32
    %c0_i32_1 = arith.constant 0 : i32
    return %c0_i32, %c0_i32_0 : i32, i32
  }
  func.func @transform_7(%arg0: i32, %arg1: i32) -> (i32, i32) {
    %c0_i32 = arith.constant 0 : i32
    %c0_i32_0 = arith.constant 0 : i32
    %c0_i32_1 = arith.constant 0 : i32
    return %c0_i32, %c0_i32_0 : i32, i32
  }
  func.func @transform_8(%arg0: i32, %arg1: i32) -> (i32, i32) {
    %c0_i32 = arith.constant 0 : i32
    %c0_i32_0 = arith.constant 0 : i32
    %c0_i32_1 = arith.constant 0 : i32
    return %c0_i32, %c0_i32_0 : i32, i32
  }
  func.func @transform_9(%arg0: i32, %arg1: i32) -> (i32, i32) {
    %c0_i32 = arith.constant 0 : i32
    %c0_i32_0 = arith.constant 0 : i32
    %c0_i32_1 = arith.constant 0 : i32
    return %c0_i32, %c0_i32_0 : i32, i32
  }
  func.func @transform_10(%arg0: i32, %arg1: i32) -> (i32, i32, i32) {
    %c0_i32 = arith.constant 0 : i32
    %c0_i32_0 = arith.constant 0 : i32
    %c0_i32_1 = arith.constant 0 : i32
    return %arg0, %c0_i32, %c0_i32_0 : i32, i32, i32
  }
}

module attributes {stable_mosaic.version = 11 : i64} {
  func.func @_perceiver_ca_kernel(%arg0: i32, %arg1: i32, %arg2: memref<2x16x32xf32, #tpu.memory_space<vmem>>, %arg3: memref<2x8x32xf32, #tpu.memory_space<vmem>>, %arg4: memref<1x32xf32, #tpu.memory_space<vmem>>, %arg5: memref<1x32xf32, #tpu.memory_space<vmem>>, %arg6: memref<1x32xf32, #tpu.memory_space<vmem>>, %arg7: memref<1x32xf32, #tpu.memory_space<vmem>>, %arg8: memref<32x16xf32, #tpu.memory_space<vmem>>, %arg9: memref<32x16xf32, #tpu.memory_space<vmem>>, %arg10: memref<32x16xf32, #tpu.memory_space<vmem>>, %arg11: memref<16x32xf32, #tpu.memory_space<vmem>>, %arg12: memref<2x8x32xf32, #tpu.memory_space<vmem>>, %arg13: memref<2x8x16xf32, #tpu.memory_space<vmem>>, %arg14: memref<2x8x1xf32, #tpu.memory_space<vmem>>, %arg15: memref<2x8x1xf32, #tpu.memory_space<vmem>>, %arg16: memref<2x8x16xf32, #tpu.memory_space<vmem>>) attributes {dimension_semantics = [#tpu.dimension_semantics<parallel>, #tpu.dimension_semantics<arbitrary>], iteration_bounds = array<i64: 2, 1>, scalar_prefetch = 0 : i64, scratch_operands = 4 : i64, tpu.core_type = #tpu.core_type<tc>, window_params = [{transform_indices = @transform_0, window_bounds = array<i64: 2, 16, 32>}, {transform_indices = @transform_1, window_bounds = array<i64: 2, 8, 32>}, {pipeline_mode = #tpu.pipeline_mode<synchronous>, transform_indices = @transform_2, window_bounds = array<i64: 1, 32>}, {pipeline_mode = #tpu.pipeline_mode<synchronous>, transform_indices = @transform_3, window_bounds = array<i64: 1, 32>}, {pipeline_mode = #tpu.pipeline_mode<synchronous>, transform_indices = @transform_4, window_bounds = array<i64: 1, 32>}, {pipeline_mode = #tpu.pipeline_mode<synchronous>, transform_indices = @transform_5, window_bounds = array<i64: 1, 32>}, {pipeline_mode = #tpu.pipeline_mode<synchronous>, transform_indices = @transform_6, window_bounds = array<i64: 32, 16>}, {pipeline_mode = #tpu.pipeline_mode<synchronous>, transform_indices = @transform_7, window_bounds = array<i64: 32, 16>}, {pipeline_mode = #tpu.pipeline_mode<synchronous>, transform_indices = @transform_8, window_bounds = array<i64: 32, 16>}, {pipeline_mode = #tpu.pipeline_mode<synchronous>, transform_indices = @transform_9, window_bounds = array<i64: 16, 32>}, {transform_indices = @transform_10, window_bounds = array<i64: 2, 8, 32>}]} {
    %c0_i32 = arith.constant 0 : i32
    %0 = arith.cmpi eq, %arg1, %c0_i32 : i32
    %1 = arith.extui %0 : i1 to i32
    %c0_i32_0 = arith.constant 0 : i32
    %2 = arith.cmpi ne, %1, %c0_i32_0 : i32
    scf.if %2 {
      %c0_45 = arith.constant 0 : index
      %c0_46 = arith.constant 0 : index
      %c0_47 = arith.constant 0 : index
      %66 = vector.load %arg3[%c0_45, %c0_46, %c0_47] : memref<2x8x32xf32, #tpu.memory_space<vmem>>, vector<2x8x32xf32>
      %cst_48 = arith.constant dense<0.000000e+00> : vector<2x8xf32>
      %67 = vector.multi_reduction <add>, %66, %cst_48 [2] : vector<2x8x32xf32> to vector<2x8xf32>
      %68 = vector.shape_cast %67 : vector<2x8xf32> to vector<2x8x1xf32>
      %cst_49 = arith.constant 3.200000e+01 : f32
      %69 = vector.broadcast %cst_49 : f32 to vector<2x8x1xf32>
      %70 = arith.divf %68, %69 : vector<2x8x1xf32>
      %71 = arith.mulf %66, %66 : vector<2x8x32xf32>
      %cst_50 = arith.constant dense<0.000000e+00> : vector<2x8xf32>
      %72 = vector.multi_reduction <add>, %71, %cst_50 [2] : vector<2x8x32xf32> to vector<2x8xf32>
      %73 = vector.shape_cast %72 : vector<2x8xf32> to vector<2x8x1xf32>
      %cst_51 = arith.constant 3.200000e+01 : f32
      %74 = vector.broadcast %cst_51 : f32 to vector<2x8x1xf32>
      %75 = arith.divf %73, %74 : vector<2x8x1xf32>
      %76 = arith.mulf %70, %70 : vector<2x8x1xf32>
      %77 = arith.subf %75, %76 : vector<2x8x1xf32>
      %cst_52 = arith.constant 0.000000e+00 : f32
      %78 = vector.broadcast %cst_52 : f32 to vector<2x8x1xf32>
      %79 = arith.maximumf %77, %78 : vector<2x8x1xf32>
      %80 = vector.broadcast %70 : vector<2x8x1xf32> to vector<2x8x32xf32>
      %81 = arith.subf %66, %80 : vector<2x8x32xf32>
      %cst_53 = arith.constant 9.99999974E-6 : f32
      %82 = vector.broadcast %cst_53 : f32 to vector<2x8x1xf32>
      %83 = arith.addf %79, %82 : vector<2x8x1xf32>
      %84 = math.rsqrt %83 : vector<2x8x1xf32>
      %85 = vector.broadcast %84 : vector<2x8x1xf32> to vector<2x8x32xf32>
      %86 = arith.mulf %81, %85 : vector<2x8x32xf32>
      %c0_54 = arith.constant 0 : index
      %c0_55 = arith.constant 0 : index
      %87 = vector.load %arg6[%c0_54, %c0_55] : memref<1x32xf32, #tpu.memory_space<vmem>>, vector<1x32xf32>
      %88 = vector.shape_cast %87 : vector<1x32xf32> to vector<1x1x32xf32>
      %89 = vector.broadcast %88 : vector<1x1x32xf32> to vector<2x8x32xf32>
      %90 = arith.mulf %86, %89 : vector<2x8x32xf32>
      %c0_56 = arith.constant 0 : index
      %c0_57 = arith.constant 0 : index
      %91 = vector.load %arg7[%c0_56, %c0_57] : memref<1x32xf32, #tpu.memory_space<vmem>>, vector<1x32xf32>
      %92 = vector.shape_cast %91 : vector<1x32xf32> to vector<1x1x32xf32>
      %93 = vector.broadcast %92 : vector<1x1x32xf32> to vector<2x8x32xf32>
      %94 = arith.addf %90, %93 : vector<2x8x32xf32>
      %95 = vector.shape_cast %94 : vector<2x8x32xf32> to vector<16x32xf32>
      %c0_58 = arith.constant 0 : index
      %c0_59 = arith.constant 0 : index
      %96 = vector.load %arg8[%c0_58, %c0_59] : memref<32x16xf32, #tpu.memory_space<vmem>>, vector<32x16xf32>
      %cst_60 = arith.constant dense<0.000000e+00> : vector<16x16xf32>
      %97 = tpu.matmul %95, %96, %cst_60 {dimension_numbers = #tpu.dot_dimension_numbers<[1], [0], [0], [1], [0, 0, 1, 1], [], []>} : vector<16x32xf32>, vector<32x16xf32>, vector<16x16xf32> -> vector<16x16xf32>
      %cst_61 = arith.constant 2.500000e-01 : f32
      %98 = vector.broadcast %cst_61 : f32 to vector<16x16xf32>
      %99 = arith.mulf %97, %98 : vector<16x16xf32>
      %100 = vector.shape_cast %99 : vector<16x16xf32> to vector<2x8x16xf32>
      %c0_62 = arith.constant 0 : index
      %c0_63 = arith.constant 0 : index
      %c0_64 = arith.constant 0 : index
      %101 = vector.load %arg13[%c0_62, %c0_63, %c0_64] : memref<2x8x16xf32, #tpu.memory_space<vmem>>, vector<2x8x16xf32>
      tpu.vector_store %arg13[%c0_62, %c0_63, %c0_64], %100 {strides = array<i32>} : memref<2x8x16xf32, #tpu.memory_space<vmem>>, vector<2x8x16xf32>,
      %cst_65 = arith.constant 0xFF800000 : f32
      %102 = vector.broadcast %cst_65 : f32 to vector<2x8x1xf32>
      %c0_66 = arith.constant 0 : index
      %c0_67 = arith.constant 0 : index
      %c0_68 = arith.constant 0 : index
      %103 = vector.load %arg14[%c0_66, %c0_67, %c0_68] : memref<2x8x1xf32, #tpu.memory_space<vmem>>, vector<2x8x1xf32>
      tpu.vector_store %arg14[%c0_66, %c0_67, %c0_68], %102 {strides = array<i32>} : memref<2x8x1xf32, #tpu.memory_space<vmem>>, vector<2x8x1xf32>,
      %cst_69 = arith.constant 0.000000e+00 : f32
      %104 = vector.broadcast %cst_69 : f32 to vector<2x8x1xf32>
      %c0_70 = arith.constant 0 : index
      %c0_71 = arith.constant 0 : index
      %c0_72 = arith.constant 0 : index
      %105 = vector.load %arg15[%c0_70, %c0_71, %c0_72] : memref<2x8x1xf32, #tpu.memory_space<vmem>>, vector<2x8x1xf32>
      tpu.vector_store %arg15[%c0_70, %c0_71, %c0_72], %104 {strides = array<i32>} : memref<2x8x1xf32, #tpu.memory_space<vmem>>, vector<2x8x1xf32>,
      %cst_73 = arith.constant 0.000000e+00 : f32
      %106 = vector.broadcast %cst_73 : f32 to vector<2x8x16xf32>
      %c0_74 = arith.constant 0 : index
      %c0_75 = arith.constant 0 : index
      %c0_76 = arith.constant 0 : index
      %107 = vector.load %arg16[%c0_74, %c0_75, %c0_76] : memref<2x8x16xf32, #tpu.memory_space<vmem>>, vector<2x8x16xf32>
      tpu.vector_store %arg16[%c0_74, %c0_75, %c0_76], %106 {strides = array<i32>} : memref<2x8x16xf32, #tpu.memory_space<vmem>>, vector<2x8x16xf32>,
    } else {
    }
    %c0 = arith.constant 0 : index
    %c0_1 = arith.constant 0 : index
    %c0_2 = arith.constant 0 : index
    %3 = vector.load %arg2[%c0, %c0_1, %c0_2] : memref<2x16x32xf32, #tpu.memory_space<vmem>>, vector<2x16x32xf32>
    %cst = arith.constant dense<0.000000e+00> : vector<2x16xf32>
    %4 = vector.multi_reduction <add>, %3, %cst [2] : vector<2x16x32xf32> to vector<2x16xf32>
    %5 = vector.shape_cast %4 : vector<2x16xf32> to vector<2x16x1xf32>
    %cst_3 = arith.constant 3.200000e+01 : f32
    %6 = vector.broadcast %cst_3 : f32 to vector<2x16x1xf32>
    %7 = arith.divf %5, %6 : vector<2x16x1xf32>
    %8 = arith.mulf %3, %3 : vector<2x16x32xf32>
    %cst_4 = arith.constant dense<0.000000e+00> : vector<2x16xf32>
    %9 = vector.multi_reduction <add>, %8, %cst_4 [2] : vector<2x16x32xf32> to vector<2x16xf32>
    %10 = vector.shape_cast %9 : vector<2x16xf32> to vector<2x16x1xf32>
    %cst_5 = arith.constant 3.200000e+01 : f32
    %11 = vector.broadcast %cst_5 : f32 to vector<2x16x1xf32>
    %12 = arith.divf %10, %11 : vector<2x16x1xf32>
    %13 = arith.mulf %7, %7 : vector<2x16x1xf32>
    %14 = arith.subf %12, %13 : vector<2x16x1xf32>
    %cst_6 = arith.constant 0.000000e+00 : f32
    %15 = vector.broadcast %cst_6 : f32 to vector<2x16x1xf32>
    %16 = arith.maximumf %14, %15 : vector<2x16x1xf32>
    %17 = vector.broadcast %7 : vector<2x16x1xf32> to vector<2x16x32xf32>
    %18 = arith.subf %3, %17 : vector<2x16x32xf32>
    %cst_7 = arith.constant 9.99999974E-6 : f32
    %19 = vector.broadcast %cst_7 : f32 to vector<2x16x1xf32>
    %20 = arith.addf %16, %19 : vector<2x16x1xf32>
    %21 = math.rsqrt %20 : vector<2x16x1xf32>
    %22 = vector.broadcast %21 : vector<2x16x1xf32> to vector<2x16x32xf32>
    %23 = arith.mulf %18, %22 : vector<2x16x32xf32>
    %c0_8 = arith.constant 0 : index
    %c0_9 = arith.constant 0 : index
    %24 = vector.load %arg4[%c0_8, %c0_9] : memref<1x32xf32, #tpu.memory_space<vmem>>, vector<1x32xf32>
    %25 = vector.shape_cast %24 : vector<1x32xf32> to vector<1x1x32xf32>
    %26 = vector.broadcast %25 : vector<1x1x32xf32> to vector<2x16x32xf32>
    %27 = arith.mulf %23, %26 : vector<2x16x32xf32>
    %c0_10 = arith.constant 0 : index
    %c0_11 = arith.constant 0 : index
    %28 = vector.load %arg5[%c0_10, %c0_11] : memref<1x32xf32, #tpu.memory_space<vmem>>, vector<1x32xf32>
    %29 = vector.shape_cast %28 : vector<1x32xf32> to vector<1x1x32xf32>
    %30 = vector.broadcast %29 : vector<1x1x32xf32> to vector<2x16x32xf32>
    %31 = arith.addf %27, %30 : vector<2x16x32xf32>
    %32 = vector.shape_cast %31 : vector<2x16x32xf32> to vector<32x32xf32>
    %c0_12 = arith.constant 0 : index
    %c0_13 = arith.constant 0 : index
    %33 = vector.load %arg9[%c0_12, %c0_13] : memref<32x16xf32, #tpu.memory_space<vmem>>, vector<32x16xf32>
    %cst_14 = arith.constant dense<0.000000e+00> : vector<32x16xf32>
    %34 = tpu.matmul %32, %33, %cst_14 {dimension_numbers = #tpu.dot_dimension_numbers<[1], [0], [0], [1], [0, 0, 1, 1], [], []>} : vector<32x32xf32>, vector<32x16xf32>, vector<32x16xf32> -> vector<32x16xf32>
    %35 = vector.shape_cast %34 : vector<32x16xf32> to vector<2x16x16xf32>
    %c0_15 = arith.constant 0 : index
    %c0_16 = arith.constant 0 : index
    %36 = vector.load %arg10[%c0_15, %c0_16] : memref<32x16xf32, #tpu.memory_space<vmem>>, vector<32x16xf32>
    %cst_17 = arith.constant dense<0.000000e+00> : vector<32x16xf32>
    %37 = tpu.matmul %32, %36, %cst_17 {dimension_numbers = #tpu.dot_dimension_numbers<[1], [0], [0], [1], [0, 0, 1, 1], [], []>} : vector<32x32xf32>, vector<32x16xf32>, vector<32x16xf32> -> vector<32x16xf32>
    %38 = vector.shape_cast %37 : vector<32x16xf32> to vector<2x16x16xf32>
    %c0_18 = arith.constant 0 : index
    %c0_19 = arith.constant 0 : index
    %c0_20 = arith.constant 0 : index
    %39 = vector.load %arg13[%c0_18, %c0_19, %c0_20] : memref<2x8x16xf32, #tpu.memory_space<vmem>>, vector<2x8x16xf32>
    %cst_21 = arith.constant dense<0.000000e+00> : vector<2x8x16xf32>
    %40 = tpu.matmul %39, %35, %cst_21 {dimension_numbers = #tpu.dot_dimension_numbers<[2], [2], [1], [1], [0, 0, 0, 1, 1, 1], [0], [0]>} : vector<2x8x16xf32>, vector<2x16x16xf32>, vector<2x8x16xf32> -> vector<2x8x16xf32>
    %c0_22 = arith.constant 0 : index
    %c0_23 = arith.constant 0 : index
    %c0_24 = arith.constant 0 : index
    %41 = vector.load %arg14[%c0_22, %c0_23, %c0_24] : memref<2x8x1xf32, #tpu.memory_space<vmem>>, vector<2x8x1xf32>
    %cst_25 = arith.constant dense<0xFF800000> : vector<2x8xf32>
    %42 = vector.multi_reduction <maximumf>, %40, %cst_25 [2] : vector<2x8x16xf32> to vector<2x8xf32>
    %43 = vector.shape_cast %42 : vector<2x8xf32> to vector<2x8x1xf32>
    %44 = arith.maximumf %41, %43 : vector<2x8x1xf32>
    %45 = arith.subf %41, %44 : vector<2x8x1xf32>
    %46 = math.exp %45 : vector<2x8x1xf32>
    %47 = vector.broadcast %44 : vector<2x8x1xf32> to vector<2x8x16xf32>
    %48 = arith.subf %40, %47 : vector<2x8x16xf32>
    %49 = math.exp %48 : vector<2x8x16xf32>
    %c0_26 = arith.constant 0 : index
    %c0_27 = arith.constant 0 : index
    %c0_28 = arith.constant 0 : index
    %50 = vector.load %arg15[%c0_26, %c0_27, %c0_28] : memref<2x8x1xf32, #tpu.memory_space<vmem>>, vector<2x8x1xf32>
    %51 = arith.mulf %46, %50 : vector<2x8x1xf32>
    %cst_29 = arith.constant dense<0.000000e+00> : vector<2x8xf32>
    %52 = vector.multi_reduction <add>, %49, %cst_29 [2] : vector<2x8x16xf32> to vector<2x8xf32>
    %53 = vector.shape_cast %52 : vector<2x8xf32> to vector<2x8x1xf32>
    %54 = arith.addf %51, %53 : vector<2x8x1xf32>
    %c0_30 = arith.constant 0 : index
    %c0_31 = arith.constant 0 : index
    %c0_32 = arith.constant 0 : index
    %55 = vector.load %arg15[%c0_30, %c0_31, %c0_32] : memref<2x8x1xf32, #tpu.memory_space<vmem>>, vector<2x8x1xf32>
    tpu.vector_store %arg15[%c0_30, %c0_31, %c0_32], %54 {strides = array<i32>} : memref<2x8x1xf32, #tpu.memory_space<vmem>>, vector<2x8x1xf32>,
    %c0_33 = arith.constant 0 : index
    %c0_34 = arith.constant 0 : index
    %c0_35 = arith.constant 0 : index
    %56 = vector.load %arg16[%c0_33, %c0_34, %c0_35] : memref<2x8x16xf32, #tpu.memory_space<vmem>>, vector<2x8x16xf32>
    %57 = vector.broadcast %46 : vector<2x8x1xf32> to vector<2x8x16xf32>
    %58 = arith.mulf %57, %56 : vector<2x8x16xf32>
    %cst_36 = arith.constant dense<0.000000e+00> : vector<2x8x16xf32>
    %59 = tpu.matmul %49, %38, %cst_36 {dimension_numbers = #tpu.dot_dimension_numbers<[2], [1], [1], [2], [0, 0, 0, 1, 1, 2], [0], [0]>} : vector<2x8x16xf32>, vector<2x16x16xf32>, vector<2x8x16xf32> -> vector<2x8x16xf32>
    %60 = arith.addf %58, %59 : vector<2x8x16xf32>
    %c0_37 = arith.constant 0 : index
    %c0_38 = arith.constant 0 : index
    %c0_39 = arith.constant 0 : index
    %61 = vector.load %arg16[%c0_37, %c0_38, %c0_39] : memref<2x8x16xf32, #tpu.memory_space<vmem>>, vector<2x8x16xf32>
    tpu.vector_store %arg16[%c0_37, %c0_38, %c0_39], %60 {strides = array<i32>} : memref<2x8x16xf32, #tpu.memory_space<vmem>>, vector<2x8x16xf32>,
    %c0_40 = arith.constant 0 : index
    %c0_41 = arith.constant 0 : index
    %c0_42 = arith.constant 0 : index
    %62 = vector.load %arg14[%c0_40, %c0_41, %c0_42] : memref<2x8x1xf32, #tpu.memory_space<vmem>>, vector<2x8x1xf32>
    tpu.vector_store %arg14[%c0_40, %c0_41, %c0_42], %44 {strides = array<i32>} : memref<2x8x1xf32, #tpu.memory_space<vmem>>, vector<2x8x1xf32>,
    %c0_i32_43 = arith.constant 0 : i32
    %63 = arith.cmpi eq, %arg1, %c0_i32_43 : i32
    %64 = arith.extui %63 : i1 to i32
    %c0_i32_44 = arith.constant 0 : i32
    %65 = arith.cmpi ne, %64, %c0_i32_44 : i32
    scf.if %65 {
      %c0_45 = arith.constant 0 : index
      %c0_46 = arith.constant 0 : index
      %c0_47 = arith.constant 0 : index
      %66 = vector.load %arg16[%c0_45, %c0_46, %c0_47] : memref<2x8x16xf32, #tpu.memory_space<vmem>>, vector<2x8x16xf32>
      %c0_48 = arith.constant 0 : index
      %c0_49 = arith.constant 0 : index
      %c0_50 = arith.constant 0 : index
      %67 = vector.load %arg15[%c0_48, %c0_49, %c0_50] : memref<2x8x1xf32, #tpu.memory_space<vmem>>, vector<2x8x1xf32>
      %68 = tpu.reciprocal %67 {approx = true} : vector<2x8x1xf32> -> vector<2x8x1xf32>
      %69 = vector.broadcast %68 : vector<2x8x1xf32> to vector<2x8x16xf32>
      %70 = arith.mulf %66, %69 : vector<2x8x16xf32>
      %71 = vector.shape_cast %70 : vector<2x8x16xf32> to vector<16x16xf32>
      %c0_51 = arith.constant 0 : index
      %c0_52 = arith.constant 0 : index
      %72 = vector.load %arg11[%c0_51, %c0_52] : memref<16x32xf32, #tpu.memory_space<vmem>>, vector<16x32xf32>
      %cst_53 = arith.constant dense<0.000000e+00> : vector<16x32xf32>
      %73 = tpu.matmul %71, %72, %cst_53 {dimension_numbers = #tpu.dot_dimension_numbers<[1], [0], [0], [1], [0, 0, 1, 1], [], []>} : vector<16x16xf32>, vector<16x32xf32>, vector<16x32xf32> -> vector<16x32xf32>
      %74 = vector.shape_cast %73 : vector<16x32xf32> to vector<2x8x32xf32>
      %c0_54 = arith.constant 0 : index
      %c0_55 = arith.constant 0 : index
      %c0_56 = arith.constant 0 : index
      %75 = vector.load %arg12[%c0_54, %c0_55, %c0_56] : memref<2x8x32xf32, #tpu.memory_space<vmem>>, vector<2x8x32xf32>
      tpu.vector_store %arg12[%c0_54, %c0_55, %c0_56], %74 {strides = array<i32>} : memref<2x8x32xf32, #tpu.memory_space<vmem>>, vector<2x8x32xf32>,
    } else {
    }
    return
  }
  func.func @transform_0(%arg0: i32, %arg1: i32) -> (i32, i32, i32) {
    %c0_i32 = arith.constant 0 : i32
    %c0_i32_0 = arith.constant 0 : i32
    return %arg0, %arg1, %c0_i32 : i32, i32, i32
  }
  func.func @transform_1(%arg0: i32, %arg1: i32) -> (i32, i32, i32) {
    %c0_i32 = arith.constant 0 : i32
    %c0_i32_0 = arith.constant 0 : i32
    %c0_i32_1 = arith.constant 0 : i32
    return %arg0, %c0_i32, %c0_i32_0 : i32, i32, i32
  }
  func.func @transform_2(%arg0: i32, %arg1: i32) -> (i32, i32) {
    %c0_i32 = arith.constant 0 : i32
    %c0_i32_0 = arith.constant 0 : i32
    %c0_i32_1 = arith.constant 0 : i32
    return %c0_i32, %c0_i32_0 : i32, i32
  }
  func.func @transform_3(%arg0: i32, %arg1: i32) -> (i32, i32) {
    %c0_i32 = arith.constant 0 : i32
    %c0_i32_0 = arith.constant 0 : i32
    %c0_i32_1 = arith.constant 0 : i32
    return %c0_i32, %c0_i32_0 : i32, i32
  }
  func.func @transform_4(%arg0: i32, %arg1: i32) -> (i32, i32) {
    %c0_i32 = arith.constant 0 : i32
    %c0_i32_0 = arith.constant 0 : i32
    %c0_i32_1 = arith.constant 0 : i32
    return %c0_i32, %c0_i32_0 : i32, i32
  }
  func.func @transform_5(%arg0: i32, %arg1: i32) -> (i32, i32) {
    %c0_i32 = arith.constant 0 : i32
    %c0_i32_0 = arith.constant 0 : i32
    %c0_i32_1 = arith.constant 0 : i32
    return %c0_i32, %c0_i32_0 : i32, i32
  }
  func.func @transform_6(%arg0: i32, %arg1: i32) -> (i32, i32) {
    %c0_i32 = arith.constant 0 : i32
    %c0_i32_0 = arith.constant 0 : i32
    %c0_i32_1 = arith.constant 0 : i32
    return %c0_i32, %c0_i32_0 : i32, i32
  }
  func.func @transform_7(%arg0: i32, %arg1: i32) -> (i32, i32) {
    %c0_i32 = arith.constant 0 : i32
    %c0_i32_0 = arith.constant 0 : i32
    %c0_i32_1 = arith.constant 0 : i32
    return %c0_i32, %c0_i32_0 : i32, i32
  }
  func.func @transform_8(%arg0: i32, %arg1: i32) -> (i32, i32) {
    %c0_i32 = arith.constant 0 : i32
    %c0_i32_0 = arith.constant 0 : i32
    %c0_i32_1 = arith.constant 0 : i32
    return %c0_i32, %c0_i32_0 : i32, i32
  }
  func.func @transform_9(%arg0: i32, %arg1: i32) -> (i32, i32) {
    %c0_i32 = arith.constant 0 : i32
    %c0_i32_0 = arith.constant 0 : i32
    %c0_i32_1 = arith.constant 0 : i32
    return %c0_i32, %c0_i32_0 : i32, i32
  }
  func.func @transform_10(%arg0: i32, %arg1: i32) -> (i32, i32, i32) {
    %c0_i32 = arith.constant 0 : i32
    %c0_i32_0 = arith.constant 0 : i32
    %c0_i32_1 = arith.constant 0 : i32
    return %arg0, %c0_i32, %c0_i32_0 : i32, i32, i32
  }
}

</mosaic_0001>

<bundles_post_ra>
// kernel: tpu_custom_call.1
= control target key start
LH: loop header
LB: loop body
LE: loop exit
PB: predicated region body
PF: predicated region fallthrough
CT: control target
= control target key end

     0   :  { %s2106_s0 = inlined_call_operand.vmem [shape: f32[4,16,32], index: 0, kind: input, shape index: {}]   ;;  %s2107_s1 = inlined_call_operand.vmem [shape: f32[4,8,32], index: 1, kind: input, shape index: {}]   ;;  %s2108_s2 = inlined_call_operand.vmem [shape: f32[1,32], index: 2, kind: input, shape index: {}]   ;;  %s2109_s3 = inlined_call_operand.vmem [shape: f32[1,32], index: 3, kind: input, shape index: {}]   ;;  %s2110_s4 = inlined_call_operand.vmem [shape: f32[1,32], index: 4, kind: input, shape index: {}]   ;;  %s2111_s5 = inlined_call_operand.vmem [shape: f32[1,32], index: 5, kind: input, shape index: {}]   ;;  %s2112_s6 = inlined_call_operand.vmem [shape: f32[32,16], index: 6, kind: input, shape index: {}]   ;;  %s2113_s7 = inlined_call_operand.vmem [shape: f32[32,16], index: 7, kind: input, shape index: {}]   ;;  %s2114_s8 = inlined_call_operand.vmem [shape: f32[32,16], index: 8, kind: input, shape index: {}]   ;;  %s2115_s9 = inlined_call_operand.vmem [shape: f32[16,32], index: 9, kind: input, shape index: {}]   ;;  %s2116_s10 = inlined_call_operand.hbm [shape: f32[4,8,32], index: 10, kind: output, shape index: {}]  }
   0x1   :  { %2117 = sst [smem:[#allocation9_spill]] %s2106_s0 }
   0x2   :  { %15 = vsyncpa [#allocation7], 0 }
   0x3   :  { %17 = vsyncpa [#allocation7 + $0x1], 0  ;;  %s1814_s13 = smov 0   ;;  %s1816_s14 = smov 0  }
   0x4   :  { %s1818_s15 = smov 0   ;;  %s1820_s16 = smov 0  }
   0x5   :  { %s1822_s17 = smov 0   ;;  %s1824_s18 = smov 0  }
   0x6 LB: > { %s1433_s19 = sadd.s32 4294967295, %s1750_s18   ;;  %s1434_s20 = sadd.s32 4294967294, %s1750_s18   ;;  %s1750_s18 = sphi %s1824_s18, %s23_s18   ;;  %s1746_s17 = sphi %s1822_s17, %s2125_s17   ;;  %s1742_s16 = sphi %s1820_s16, %s2124_s16   ;;  %s1738_s15 = sphi %s1818_s15, %s2123_s15   ;;  %s1734_s14 = sphi %s1816_s14, %s2122_s14   ;;  %s1730_s13 = sphi %s1814_s13, %s2121_s13  }
   0x7   : > { %s35_s21 = sadd.s32 1, %s1746_s17  ;;  %s264_s22 = sadd.s32 1, %s1738_s15 }
   0x8   : > { %p37_p0 = scmp.ge.s32.totalorder %s35_s21, 2  ;;  %p274_p1 = scmp.ne.s32.totalorder %s1738_s15, %s1734_s14 }
   0x9   : > { %p275_p2 = scmp.eq.s32.totalorder %s1433_s19, 1  ;;  %p280_p3 = scmp.ne.s32.totalorder %s1734_s14, %s1730_s13 }
   0xa   : > { %s2127_s21 = smov (%p37_p0, %s35_s21), 0  ;;  %p281_p5 = scmp.eq.s32.totalorder %s1434_s20, 1 }
   0xb   : > { %p1854_p4 = por %p275_p2, %p274_p1  ;;  %s261_s24 = ssub.s32 %s1746_s17, %s2127_s21 }
   0xc   : > { %p1437_p6 = scmp.ge.s32.totalorder %s1750_s18, 1  ;;  %p262_p7 = scmp.eq.s32.totalorder %s261_s24, 0 }
   0xd   : > { %p1861_p8 = por %p281_p5, %p280_p3  ;;  %p347_p9 = scmp.lt.s32.totalorder %s1750_s18, 3 }
   0xe   : > { %s1867_s26 = scalar_select %p262_p7, %s1738_s15, %s264_s22  }
   0xf   : > { %p348_p10 = pnand %p1437_p6, %p347_p9 }
  0x10   : > { %s1439_s27 = sshll.u32 (!%p348_p10), %s1742_s16, 1  ;;  %s2120_s0 = sld [smem:[#allocation9_spill]] (!%p348_p10) }
  0x11   : > { %351 = sbr.rel (%p348_p10) target bundleno = 1389 (0x56d), region = 60  ;;  %p397_p11 = scmp.lt.s32.totalorder (!%p348_p10), %s1439_s27, 3 }
  0x12   : > { %s1474_s22 = sshll.u32 (!%p348_p10), %s1742_s16, 8  ;;  %s1756_s16 = smov (!%p348_p10), [#allocation6]  }
  0x16   : > { %s2129_s27 = smov (!%p397_p11, %s1439_s27), 3  ;;  %vm420_vm0 = vcmask 261120   ;;  %v475_v24 = vld [vmem:[%s2112_s6 + $0x18] sm:$0xff]  ;;  %v474_v25 = vld [vmem:[%s2112_s6 + $0x10] sm:$0xff]  ;;  %v473_v26 = vld [vmem:[%s2112_s6 + $0x8] sm:$0xff]  ;;  %vm559_vm1 = vcmask 130048  }
  0x17   : > { %s1443_s28 = sshll.u32 %s2129_s27, 3  ;;  %s1473_s29 = sshll.u32 %s2129_s27, 4  ;;  %1513 = vmatprep.subr.mxu0 %v475_v24  ;;  %v472_v27 = vld [vmem:[%s2112_s6] sm:$0xff]  ;;  %v664_v28 = vld [vmem:[%s2113_s7 + $0x18] sm:$0xff]  ;;  %v663_v29 = vld [vmem:[%s2113_s7 + $0x10] sm:$0xff]  ;;  %vm1753_vm2 = vmmov 0  }
  0x18   : > { %s411_s12 = scalar_lea.vmem %s2107_s1, %s1443_s28  ;;  %s404_s24 = scalar_lea.vmem %s2120_s0, %s1473_s29  ;;  %1514 = vmatpush3.msra.mxu0 %v475_v24  ;;  %1524 = vmatprep.subr.mxu1 %v664_v28  ;;  %v1939_v30 = vld [vmem:[%s2114_s8 + $0x18] sm:$0xff]  ;;  %v662_v31 = vld [vmem:[%s2113_s7 + $0x8] sm:$0xff]  ;;  %v661_v32 = vld [vmem:[%s2113_s7] sm:$0xff]  ;;  %vm562_vm3 = vcmask 7168  }
  0x19   : > { %v1876_v0 = vld [vmem:[%s411_s12] sm:$0xff]  ;;  %v1878_v1 = vld [vmem:[%s404_s24 + $0x8] sm:$0xff]  ;;  %v1904_v16 = vld [vmem:[%s404_s24 + $0x18] sm:$0xff]  ;;  %1515 = vmatprep.subr.mxu0 %v474_v25  ;;  %1525 = vmatpush3.msra.mxu1 %v664_v28  ;;  %s2058_s29 = scalar_lea.hbm %s2116_s10, %s1474_s22 }
  0x1a   : > { %v1880_v2 = vld [vmem:[%s411_s12 + $0x8] sm:$0xff]  ;;  %v421_v3 = vsel %vm420_vm0, %v1876_v0, 0.0  ;;  %v577_v4 = vsel %vm420_vm0, %v1878_v1, 0.0  ;;  %v430_v5 = vmul.f32 %v1876_v0, %v1876_v0  ;;  %v1893_v9 = vld [vmem:[%s404_s24] sm:$0xff]  ;;  %v592_v12 = vmul.f32 %v1878_v1, %v1878_v1  ;;  %v1906_v17 = vld [vmem:[%s404_s24 + $0x10] sm:$0xff]  ;;  %1516 = vmatpush3.msra.mxu0 %v474_v25  ;;  %1526 = vmatprep.subr.mxu1 %v663_v29  ;;  %s392_s12 = sand.u32 1, %s1734_s14  }
  0x1b   : > { %422 = vadd.xlane.f32.xlu0 %v421_v3  ;;  %578 = vadd.xlane.f32.xlu1 %v577_v4  ;;  %v424_v6 = vsel %vm420_vm0, %v1880_v2, 0.0  ;;  %v431_v8 = vmul.f32 %v1880_v2, %v1880_v2  ;;  %v574_v11 = vsel %vm420_vm0, %v1893_v9, 0.0  ;;  %v591_v13 = vmul.f32 %v1893_v9, %v1893_v9  ;;  %s1438_s19 = sshll.u32 %s392_s12, 4  ;;  %s2061_s30 = scalar_lea.sflag [#allocation7], %s392_s12 }
  0x1c   : > { %v432_v7 = vsel %vm420_vm0, %v430_v5, 0.0  ;;  %v598_v14 = vsel %vm420_vm0, %v592_v12, 0.0  ;;  %v583_v18 = vsel %vm420_vm0, %v1904_v16, 0.0  ;;  %v580_v19 = vsel %vm420_vm0, %v1906_v17, 0.0  ;;  %1517 = vmatprep.subr.mxu0 %v473_v26  ;;  %1527 = vmatpush3.msra.mxu1 %v663_v29  ;;  %s394_s20 = scalar_lea.vmem [#allocation6], %s1438_s19  ;;  %s1678_s19 = sshll.u32 %s1756_s16, 4  ;;  %s1679_s19 = int_to_ptr.vmem [resolvable:$false] %s1678_s19 }
  0x1d   : > { %v435_v10 = vsel %vm420_vm0, %v431_v8, 0.0  ;;  %v595_v15 = vsel %vm420_vm0, %v591_v13, 0.0  ;;  %v594_v20 = vmul.f32 %v1904_v16, %v1904_v16  ;;  %v593_v21 = vmul.f32 %v1906_v17, %v1906_v17  ;;  %1518 = vmatpush3.msra.mxu0 %v473_v26  ;;  %1528 = vmatprep.subr.mxu1 %v662_v31  ;;  %s1345_s24 = sshll.u32 %s394_s20, 4  ;;  %s1680_s0 = scalar_lea.vmem %s1679_s19, 512  ;;  %s2052_s24 = int_to_ptr.vmem [resolvable:$true] %s1345_s24 }
  0x1e   : > { %1519 = vmatprep.subr.mxu0 %v472_v27  ;;  %1529 = vmatpush3.msra.mxu1 %v662_v31  ;;  %s1674_s11 = scalar_lea.vmem %s2052_s24, 256  ;;  %p1681_p1 = scmp.lt.s32.totalorder %s2052_s24, %s1679_s19 }
  0x1f   : > { %425 = vadd.xlane.f32.xlu0 %v424_v6  ;;  %433 = vadd.xlane.f32.xlu1 %v432_v7  ;;  %v604_v22 = vsel %vm420_vm0, %v594_v20, 0.0  ;;  %v601_v23 = vsel %vm420_vm0, %v593_v21, 0.0  ;;  %p1675_p12 = scmp.ne.s32.totalorder %s2052_s24, %s1674_s11  ;;  %p1682_p2 = scmp.lt.s32.totalorder %s1680_s0, %s1674_s11 }
  0x20   : > { %1520 = vmatpush3.msra.mxu0 %v472_v27  ;;  %1530 = vmatprep.subr.mxu1 %v661_v32  ;;  %v1445_v27 = vld [vmem:[%s2111_s5] ss:$0 sm:$0xff] }
  0x21   : > { %1538 = vmatprep.subr.mxu0 %v1939_v30  ;;  %1531 = vmatpush3.msra.mxu1 %v661_v32  ;;  %p1676_p13 = pnand %p1675_p12, %p1854_p4  ;;  %p1683_p3 = por %p1682_p2, %p1681_p1 }
  0x23   : > { %436 = vadd.xlane.f32.xlu1 %v435_v10  ;;  %575 = vadd.xlane.f32.xlu0 %v574_v11  ;;  %p1677_p0 = pneg %p1676_p13 }
  0x25   : > { %p1684_p5 = pnand %p1683_p3, %p1677_p0 }
  0x27   : > { %599 = vadd.xlane.f32.xlu1 %v598_v14  ;;  %596 = vadd.xlane.f32.xlu0 %v595_v15 }
  0x2b   : > { %584 = vadd.xlane.f32.xlu1 %v583_v18  ;;  %581 = vadd.xlane.f32.xlu0 %v580_v19 }
  0x2f   : > { %605 = vadd.xlane.f32.xlu1 %v604_v22  ;;  %602 = vadd.xlane.f32.xlu0 %v601_v23  ;;  %v1444_v23 = vld [vmem:[%s2110_s4] ss:$0 sm:$0xff] }
  0xa4   : > { %v423_v33 = vpop.xlane.xlu0 %422  ;;  %v579_v34 = vpop.xlane.xlu1 %578 }
  0xa5   : > { %v428_v35 = vmul.f32 0.03125, %v423_v33  ;;  %v1948_v42 = vmul.f32 0.03125, %v579_v34 }
  0xa7   : > { %v440_v38 = vmul.f32 %v428_v35, %v428_v35  ;;  %v612_v51 = vmul.f32 %v1948_v42, %v1948_v42  ;;  %v446_v19 = vsub.f32 %v1876_v0, %v428_v35  ;;  %v624_v33 = vsub.f32 %v1878_v1, %v1948_v42  ;;  %v1449_v1 = vld [vmem:[%s2109_s3] ss:$0 sm:$0xff] }
  0xa8   : > { %v426_v36 = vpop.xlane.xlu0 %425  ;;  %v434_v37 = vpop.xlane.xlu1 %433 }
  0xa9   : > { %v429_v39 = vmul.f32 0.03125, %v426_v36  ;;  %v438_v40 = vmul.f32 0.03125, %v434_v37  ;;  %v1448_v37 = vld [vmem:[%s2108_s2] ss:$0 sm:$0xff] }
  0xab   : > { %v442_v41 = vsub.f32 %v438_v40, %v440_v38  ;;  %v441_v45 = vmul.f32 %v429_v39, %v429_v39  ;;  %v447_v28 = vsub.f32 %v1880_v2, %v429_v39  ;;  %v764_v40 = vld [vmem:[%s2114_s8 + $0x10] sm:$0xff] }
  0xac   : > { %v437_v43 = vpop.xlane.xlu1 %436  ;;  %v576_v44 = vpop.xlane.xlu0 %575 }
  0xad   : > { %v444_v46 = vmax.f32 %v442_v41, 0.0  ;;  %v439_v47 = vmul.f32 0.03125, %v437_v43  ;;  %v587_v48 = vmul.f32 0.03125, %v576_v44 }
  0xaf   : > { %v448_v49 = vadd.f32 1e-05, %v444_v46  ;;  %v443_v50 = vsub.f32 %v439_v47, %v441_v45  ;;  %v611_v52 = vmul.f32 %v587_v48, %v587_v48  ;;  %v623_v36 = vsub.f32 %v1893_v9, %v587_v48  ;;  %v763_v9 = vld [vmem:[%s2114_s8 + $0x8] sm:$0xff]  ;;  %v762_v47 = vld [vmem:[%s2114_s8] sm:$0xff] }
  0xb0   : > { %v600_v53 = vpop.xlane.xlu1 %599  ;;  %v597_v54 = vpop.xlane.xlu0 %596 }
  0xb1   : > { %1650 = vrsqrt.f32 %v448_v49  ;;  %v445_v55 = vmax.f32 %v443_v50, 0.0  ;;  %v608_v56 = vmul.f32 0.03125, %v600_v53  ;;  %v607_v57 = vmul.f32 0.03125, %v597_v54 }
  0xb3   : > { %v449_v58 = vadd.f32 1e-05, %v445_v55  ;;  %v616_v59 = vsub.f32 %v608_v56, %v612_v51  ;;  %v615_v60 = vsub.f32 %v607_v57, %v611_v52 }
  0xb4   : > { %v585_v61 = vpop.xlane.xlu1 %584  ;;  %v582_v62 = vpop.xlane.xlu0 %581 }
  0xb5   : > { %1652 = vrsqrt.f32 %v449_v58  ;;  %v620_v63 = vmax.f32 %v616_v59, 0.0  ;;  %v619_v3 = vmax.f32 %v615_v60, 0.0  ;;  %v590_v4 = vmul.f32 0.03125, %v585_v61 }
  0xb6   : > { %v1952_v5 = vmul.f32 0.03125, %v582_v62 }
  0xb7   : > { %v628_v6 = vadd.f32 1e-05, %v620_v63  ;;  %v627_v7 = vadd.f32 1e-05, %v619_v3  ;;  %v614_v8 = vmul.f32 %v590_v4, %v590_v4  ;;  %v626_v46 = vsub.f32 %v1904_v16, %v590_v4 }
  0xb8   : > { %v606_v10 = vpop.xlane.xlu1 %605  ;;  %v603_v11 = vpop.xlane.xlu0 %602  ;;  %v613_v12 = vmul.f32 %v1952_v5, %v1952_v5 }
  0xb9   : > { %1654 = vrsqrt.f32 %v628_v6  ;;  %v610_v13 = vmul.f32 0.03125, %v606_v10  ;;  %v609_v14 = vmul.f32 0.03125, %v603_v11  ;;  %v1754_v6 = vmov -inf  }
  0xba   : > { %1656 = vrsqrt.f32 %v627_v7  ;;  %563 = vst.msk [vmem:[#allocation3] sm:$0xff] %vm562_vm3, %v1754_v6  ;;  %564 = vst.msk [vmem:[#allocation3 + $0x8] sm:$0xff] %vm562_vm3, %v1754_v6 }
  0xbb   : > { %v618_v15 = vsub.f32 %v610_v13, %v614_v8  ;;  %v617_v18 = vsub.f32 %v609_v14, %v613_v12 }
  0xbd   : > { %v622_v20 = vmax.f32 %v618_v15, 0.0  ;;  %v621_v21 = vmax.f32 %v617_v18, 0.0  ;;  %v1755_v18 = vmov 0  }
  0xbe   : > { %v1651_v22 = vpop.eup %1650  ;;  %1648 = vset.pattern.permute.xlu0 %v1755_v18  ;;  %1649 = vset.pattern.permute.xlu1 %v1755_v18 }
  0xbf   : > { %v630_v24 = vadd.f32 1e-05, %v622_v20  ;;  %v629_v25 = vadd.f32 1e-05, %v621_v21  ;;  %v452_v26 = vmul.f32 %v1651_v22, %v446_v19 }
  0xc1   : > { %1658 = vrsqrt.f32 %v630_v24  ;;  %v461_v29 = vmul.f32 %v1444_v23, %v452_v26  ;;  %v1012_v19 = vld [vmem:[#allocation3] sm:$0xff] }
  0xc2   : > { %v1653_v31 = vpop.eup %1652  ;;  %1660 = vrsqrt.f32 %v629_v25 }
  0xc3   : > { %v453_v0 = vmul.f32 %v1653_v31, %v447_v28  ;;  %v470_v32 = vadd.f32 %v1445_v27, %v461_v29 }
  0xc5   : > { %v462_v34 = vmul.f32 %v1444_v23, %v453_v0  ;;  %1521 = vmatprep.mubr.msk.f32.mxu0 %vm420_vm0, %v470_v32  ;;  %v1013_v23 = vld [vmem:[#allocation3 + $0x8] sm:$0xff] }
  0xc6   : > { %v1655_v35 = vpop.eup %1654 }
  0xc7   : > { %v1657_v2 = vpop.eup %1656  ;;  %v471_v38 = vadd.f32 %v1445_v27, %v462_v34  ;;  %v636_v39 = vmul.f32 %v1655_v35, %v624_v33 }
  0xc8   : > { %v635_v41 = vmul.f32 %v1657_v2, %v623_v36 }
  0xc9   : > { %1522 = vmatmul.mubr.msk.f32.vlgmr.msra.gmra.mxu0 %vm420_vm0, %v471_v38  ;;  %v647_v42 = vmul.f32 %v1448_v37, %v636_v39 }
  0xca   : > { %1539 = vmatpush3.msra.mxu0 %v1939_v30  ;;  %v646_v43 = vmul.f32 %v1448_v37, %v635_v41  ;;  %v625_v30 = vsub.f32 %v1906_v17, %v1952_v5  ;;  %v1752_v17 = vmov 0.0  }
  0xcb   : > { %1540 = vmatprep.subr.mxu0 %v764_v40  ;;  %v658_v44 = vadd.f32 %v1449_v1, %v647_v42  ;;  %1552 = vmatprep.subr.mxu1 %v1752_v17  ;;  %567 = vst.msk [vmem:[#allocation5] sm:$0xff] %vm559_vm1, %v1752_v17  ;;  %568 = vst.msk [vmem:[#allocation5 + $0x8] sm:$0xff] %vm559_vm1, %v1752_v17 }
  0xcc   : > { %1541 = vmatpush3.msra.mxu0 %v764_v40  ;;  %v657_v45 = vadd.f32 %v1449_v1, %v646_v43  ;;  %565 = vst.msk [vmem:[#allocation4] sm:$0xff] %vm562_vm3, %v1752_v17  ;;  %566 = vst.msk [vmem:[#allocation4 + $0x8] sm:$0xff] %vm562_vm3, %v1752_v17 }
  0xcd   : > { %1542 = vmatprep.subr.mxu0 %v763_v9 }
  0xce   : > { %v1659_v48 = vpop.eup %1658  ;;  %1532 = vmatprep.mubr.msk.f32.mxu1 %vm420_vm0, %v657_v45  ;;  %1543 = vmatpush3.msra.mxu0 %v763_v9 }
  0xcf   : > { %v1661_v49 = vpop.eup %1660  ;;  %1546 = vmatprep.mubr.msk.f32.mxu0 %vm420_vm0, %v657_v45  ;;  %1533 = vmatmul.mubr.msk.f32.vlgmr.msra.gmra.mxu1 %vm420_vm0, %v658_v44  ;;  %v638_v50 = vmul.f32 %v1659_v48, %v626_v46  ;;  %v1247_v48 = vld [vmem:[%s2115_s9 + $0x8] sm:$0xff] }
  0xd0   : > { %1544 = vmatprep.subr.mxu0 %v762_v47  ;;  %v637_v16 = vmul.f32 %v1661_v49, %v625_v30  ;;  %v1246_v49 = vld [vmem:[%s2115_s9] sm:$0xff] }
  0xd1   : > { %1545 = vmatpush3.msra.mxu0 %v762_v47  ;;  %v649_v51 = vmul.f32 %v1448_v37, %v638_v50 }
  0xd2   : > { %1547 = vmatmul.mubr.msk.f32.vlgmr.msra.gmra.mxu0 %vm420_vm0, %v658_v44  ;;  %v648_v52 = vmul.f32 %v1448_v37, %v637_v16  ;;  %1559 = vmatprep.subr.mxu0 %v1752_v17  ;;  %v1059_v16 = vld [vmem:[#allocation5] sm:$0xff] }
  0xd3   : > { %v660_v53 = vadd.f32 %v1449_v1, %v649_v51  ;;  %v1044_v40 = vld [vmem:[#allocation4] sm:$0xff]  ;;  %v1045_v9 = vld [vmem:[#allocation4 + $0x8] sm:$0xff] }
  0xd4   : > { %v659_v54 = vadd.f32 %v1449_v1, %v648_v52 }
  0xd6   : > { %1535 = vmatprep.mubr.msk.f32.mxu1 %vm420_vm0, %v659_v54  ;;  %1549 = vmatprep.mubr.msk.f32.mxu0 %vm420_vm0, %v659_v54 }
  0xd7   : > { %1536 = vmatmul.mubr.msk.f32.gmra.mxu1 %vm420_vm0, %v660_v53  ;;  %1550 = vmatmul.mubr.msk.f32.gmra.mxu0 %vm420_vm0, %v660_v53 }
  0xd8   : > { %1556 = vmatprep.mubr.msk.f32.mxu1 %vm1753_vm2, %v1752_v17  ;;  %1563 = vmatprep.mubr.msk.f32.mxu0 %vm1753_vm2, %v1752_v17 }
 0x189   : > { %v1523_v55 = vpop.f32.mrf.mxu0 }
 0x18a   : > { %v558_v56 = vmul.f32 0.25, %v1523_v55  ;;  %v1060_v55 = vld [vmem:[#allocation5 + $0x8] sm:$0xff] }
 0x18b   : > { %v548_v57 = vpop.f32.mrf.mxu0 }
 0x18c   : > { %561 = vst.msk [vmem:[#allocation2 + $0x8] sm:$0xff] %vm559_vm1, %v558_v56  ;;  %v557_v58 = vmul.f32 0.25, %v548_v57 }
 0x18e   : > { %560 = vst.msk [vmem:[#allocation2] sm:$0xff] %vm559_vm1, %v557_v58 }
 0x18f   : > { %v1534_v59 = vpop.f32.mrf.mxu1 }
 0x190   : > { %1553 = vmatpush3.xpose.msk.msra.mxu1 %vm559_vm1, %v1534_v59 }
 0x191   : > { %1554 = vmatprep.subr.mxu1 %v1752_v17  ;;  %v743_v60 = vpop.f32.mrf.mxu1 }
 0x192   : > { %v1548_v61 = vpop.f32.mrf.mxu0 }
 0x193   : > { %v852_v5 = vld [vmem:[#allocation2 + $0x8] sm:$0xff] }
 0x194   : > { %1555 = vmatpush3.xpose.msk.msra.mxu1 %vm559_vm1, %v743_v60  ;;  %v832_v3 = vpop.f32.mrf.mxu0 }
 0x195   : > { %v851_v62 = vld [vmem:[#allocation2] sm:$0xff]  ;;  %1566 = vmatprep.subr.mxu1 %v1752_v17 }
 0x197   : > { %v1537_v63 = vpop.f32.mrf.mxu1  ;;  %1557 = vmatmul.mubr.msk.f32.vlgmr.msra.gmra.mxu1 %vm559_vm1, %v851_v62  ;;  %v1551_v10 = vpop.f32.mrf.mxu0 }
 0x198   : > { %1560 = vmatpush3.xpose.msk.msra.mxu0 %vm559_vm1, %v1537_v63  ;;  %1567 = vmatpush3.msra.mxu1 %v1548_v61 }
 0x199   : > { %1568 = vmatprep.subr.mxu1 %v1752_v17  ;;  %1561 = vmatprep.subr.mxu0 %v1752_v17  ;;  %v753_v4 = vpop.f32.mrf.mxu1  ;;  %v842_v12 = vpop.f32.mrf.mxu0 }
 0x19a   : > { %1569 = vmatpush3.msra.mxu1 %v832_v3  ;;  %1570 = vmatprep.mubr.msk.f32.mxu1 %vm1753_vm2, %v1752_v17 }
 0x19b   : > { %1573 = vmatprep.subr.mxu1 %v1752_v17 }
 0x19c   : > { %1562 = vmatpush3.xpose.msk.msra.mxu0 %vm559_vm1, %v753_v4 }
 0x19d   : > { %1580 = vmatprep.subr.mxu0 %v1247_v48 }
 0x19f   : > { %1564 = vmatmul.mubr.msk.f32.vlgmr.msra.gmra.mxu0 %vm559_vm1, %v852_v5 }
 0x1a0   : > { %1581 = vmatpush3.msra.mxu0 %v1247_v48 }
 0x1a1   : > { %1582 = vmatprep.subr.mxu0 %v1246_v49 }
 0x1a2   : > { %1583 = vmatpush3.msra.mxu0 %v1246_v49 }
 0x257   : > { %v929_v7 = vpop.f32.mrf.mxu1 }
 0x258   : > { %v1014_v8 = vsel %vm559_vm1, %v929_v7, -inf }
 0x259   : > { %1015 = vmax.xlane.f32.xlu0 %v1014_v8  ;;  %v1558_v11 = vpop.f32.mrf.mxu1 }
 0x25f   : > { %v1008_v13 = vpop.f32.mrf.mxu0 }
 0x260   : > { %v1017_v14 = vsel %vm559_vm1, %v1008_v13, -inf }
 0x261   : > { %1018 = vmax.xlane.f32.xlu1 %v1017_v14  ;;  %v1565_v15 = vpop.f32.mrf.mxu0 }
 0x2e2   : > { %v1016_v20 = vpop.xlane.xlu0 %1015 }
 0x2e3   : > { %v1020_v21 = vmax.f32 %v1012_v19, %v1016_v20 }
 0x2e5   : > { %v1022_v22 = vsub.f32 %v1012_v19, %v1020_v21  ;;  %1223 = vst.msk [vmem:[#allocation3] sm:$0xff] %vm562_vm3, %v1020_v21  ;;  %1030 = vperm.xlu0 %1648, %v1020_v21  }
 0x2e7   : > { %v1024_v34 = vmul.f32 1.442695, %v1022_v22 }
 0x2ea   : > { %v1019_v24 = vpop.xlane.xlu1 %1018 }
 0x2eb   : > { %v1021_v25 = vmax.f32 %v1013_v23, %v1019_v24 }
 0x2ed   : > { %v1023_v26 = vsub.f32 %v1013_v23, %v1021_v25  ;;  %1224 = vst.msk [vmem:[#allocation3 + $0x8] sm:$0xff] %vm562_vm3, %v1021_v25  ;;  %1035 = vperm.xlu1 %1649, %v1021_v25  }
 0x2ef   : > { %v1026_v36 = vmul.f32 1.442695, %v1023_v26 }
 0x360   : > { %v1031_v27 = vpop.permute.xlu0 %1030 }
 0x361   : > { %v1038_v28 = vsub.f32 %v929_v7, %v1031_v27 }
 0x363   : > { %v1040_v29 = vmul.f32 1.442695, %v1038_v28 }
 0x365   : > { %1662 = vpow2.f32 %v1040_v29 }
 0x368   : > { %v1036_v31 = vpop.permute.xlu1 %1035 }
 0x369   : > { %v1039_v0 = vsub.f32 %v1008_v13, %v1036_v31 }
 0x36b   : > { %v1042_v32 = vmul.f32 1.442695, %v1039_v0 }
 0x36d   : > { %1664 = vpow2.f32 %v1042_v32 }
 0x36e   : > { %1666 = vpow2.f32 %v1024_v34 }
 0x36f   : > { %1668 = vpow2.f32 %v1026_v36 }
 0x372   : > { %v1663_v33 = vpop.eup %1662 }
 0x373   : > { %1571 = vmatmul.mubr.msk.f32.vlgmr.msra.gmra.mxu1 %vm559_vm1, %v1663_v33  ;;  %v1048_v35 = vsel %vm559_vm1, %v1663_v33, 0.0 }
 0x374   : > { %1574 = vmatpush3.msra.mxu1 %v1551_v10  ;;  %1049 = vadd.xlane.f32.xlu1 %v1048_v35 }
 0x375   : > { %1575 = vmatprep.subr.mxu1 %v1752_v17  ;;  %1577 = vmatprep.mubr.msk.f32.mxu1 %vm1753_vm2, %v1752_v17 }
 0x376   : > { %1576 = vmatpush3.msra.mxu1 %v842_v12 }
 0x37a   : > { %v1665_v37 = vpop.eup %1664 }
 0x37b   : > { %1578 = vmatmul.mubr.msk.f32.vlgmr.msra.gmra.mxu1 %vm559_vm1, %v1665_v37  ;;  %v1051_v2 = vsel %vm559_vm1, %v1665_v37, 0.0  ;;  %v1667_v38 = vpop.eup %1666 }
 0x37c   : > { %1052 = vadd.xlane.f32.xlu0 %v1051_v2  ;;  %v1669_v39 = vpop.eup %1668  ;;  %v1046_v41 = vmul.f32 %v1667_v38, %v1044_v40 }
 0x37d   : > { %v1047_v43 = vmul.f32 %v1669_v39, %v1045_v9 }
 0x385   : > { %1063 = vperm.xlu1 %1649, %v1667_v38  }
 0x389   : > { %1068 = vperm.xlu1 %1649, %v1669_v39  }
 0x3fd   : > { %v1050_v1 = vpop.xlane.xlu1 %1049 }
 0x3fe   : > { %v1054_v42 = vadd.f32 %v1050_v1, %v1046_v41 }
 0x400   : > { %1057 = vst.msk [vmem:[#allocation4] sm:$0xff] %vm562_vm3, %v1054_v42 }
 0x401   : > { %v1064_v51 = vpop.permute.xlu1 %1063 }
 0x402   : > { %v1071_v52 = vmul.f32 %v1064_v51, %v1059_v16 }
 0x405   : > { %v1053_v44 = vpop.xlane.xlu0 %1052  ;;  %v1069_v56 = vpop.permute.xlu1 %1068 }
 0x406   : > { %v1055_v45 = vadd.f32 %v1053_v44, %v1047_v43  ;;  %v1072_v57 = vmul.f32 %v1069_v56, %v1060_v55 }
 0x407   : > { %v1230_v46 = vld [vmem:[#allocation4] sm:$0xff] }
 0x408   : > { %1058 = vst.msk [vmem:[#allocation4 + $0x8] sm:$0xff] %vm562_vm3, %v1055_v45  ;;  %1670 = vrcp.f32 %v1230_v46 }
 0x40f   : > { %v1231_v47 = vld [vmem:[#allocation4 + $0x8] sm:$0xff] }
 0x410   : > { %1672 = vrcp.f32 %v1231_v47 }
 0x415   : > { %v1671_v30 = vpop.eup %1670 }
 0x416   : > { %1236 = vperm.xlu1 %1649, %v1671_v30  }
 0x41d   : > { %v1673_v50 = vpop.eup %1672 }
 0x41e   : > { %1241 = vperm.xlu0 %1648, %v1673_v50  }
 0x433   : > { %v1142_v53 = vpop.f32.mrf.mxu1 }
 0x434   : > { %v1219_v54 = vadd.f32 %v1142_v53, %v1071_v52 }
 0x435   : > { %v1572_v17 = vpop.f32.mrf.mxu1 }
 0x436   : > { %1221 = vst.msk [vmem:[#allocation5] sm:$0xff] %vm559_vm1, %v1219_v54 }
 0x43b   : > { %v1215_v58 = vpop.f32.mrf.mxu1 }
 0x43c   : > { %v1220_v59 = vadd.f32 %v1215_v58, %v1072_v57 }
 0x43d   : > { %v1579_v60 = vpop.f32.mrf.mxu1  ;;  %v1228_v62 = vld [vmem:[#allocation5] sm:$0xff] }
 0x43e   : > { %1222 = vst.msk [vmem:[#allocation5 + $0x8] sm:$0xff] %vm559_vm1, %v1220_v59 }
 0x445   : > { %v1229_v4 = vld [vmem:[#allocation5 + $0x8] sm:$0xff] }
 0x491   : > { %v1237_v61 = vpop.permute.xlu1 %1236 }
 0x492   : > { %v1244_v63 = vmul.f32 %v1237_v61, %v1228_v62 }
 0x494   : > { %1584 = vmatprep.mubr.msk.f32.mxu0 %vm559_vm1, %v1244_v63 }
 0x499   : > { %v1242_v3 = vpop.permute.xlu0 %1241 }
 0x49a   : > { %v1245_v5 = vmul.f32 %v1242_v3, %v1229_v4 }
 0x49c   : > { %1585 = vmatmul.mubr.msk.f32.vlgmr.msra.gmra.mxu0 %vm559_vm1, %v1245_v5 }
 0x55c   : > { %v1586_v6 = vpop.f32.mrf.mxu0 }
 0x55d   : > { %1330 = vst.msk [vmem:[%s394_s20 + $0x8] sm:$0xff] %vm420_vm0, %v1586_v6 }
 0x55e   : > { %v1320_v7 = vpop.f32.mrf.mxu0 }
 0x55f   : > { %1329 = vst.msk [vmem:[%s394_s20] sm:$0xff] %vm420_vm0, %v1320_v7 }
 0x560   : > { %1687 = shalt.err (!%p1684_p5)
}
 0x561   : > { %s1688_s12 = scalar_lea.hbm %s2058_s29, 256  ;;  %s1692_s27 = scalar_lea.hbm %s2116_s10, 512 }
 0x562   : > { %p1689_p6 = scmp.ne.s32.totalorder %s2058_s29, %s1688_s12  ;;  %p1693_p10 = scmp.lt.s32.totalorder %s2058_s29, %s2116_s10 }
 0x563   : > { %p1694_p11 = scmp.lt.s32.totalorder %s1692_s27, %s1688_s12 }
 0x564   : > { %p1690_p7 = pnand %p1689_p6, %p1854_p4 }
 0x565   : > { %p1695_p12 = por %p1694_p11, %p1693_p10 }
 0x566   : > { %p1691_p9 = pneg %p1690_p7 }
 0x568   : > { %p1696_p13 = pnand %p1695_p12, %p1691_p9 }
 0x56a   : > { %1699 = shalt.err (!%p1696_p13)
}
 0x56b   : > { %s1757_s0 = smov 128   ;;  %s1758_s11 = smov 8  }
 0x56c   : > { %1587 = dma.vmem_to_hbm [thread:$0]  (%p1854_p4), %s2052_s24, 256, %s2058_s29, %s2061_s30, %s1757_s0, %s1757_s0, %s1758_s11  }
 0x56d PF: > { %p1593_p0 = scmp.ge.s32.totalorder %s1750_s18, 2  ;;  %s1360_s19 = sand.u32 1, %s1730_s13  }
 0x56e   : > { %s1361_s12 = scalar_lea.sflag [#allocation7], %s1360_s19 }
 0x56f   : > { %p1590_p1 = pnand %p1593_p0, %p1861_p8 }
 0x571   : > { %p1591_p2 = pneg %p1590_p1 }
 0x573   : > { %1725 = dma.done.wait (%p1591_p2), %s1361_s12, 256  }
 0x574   : > { %1727 = vsyncadd (%p1591_p2), %s1361_s12, 4294967040  ;;  %s23_s18 = sadd.s32 1, %s1750_s18   ;;  %s2121_s13 = smov %s1734_s14 }
 0x575   : > { %p20_p3 = scmp.ge.s32.totalorder %s23_s18, 4   ;;  %s2122_s14 = smov %s1738_s15 }
 0x576   : > { %s2123_s15 = smov %s1867_s26  ;;  %s2124_s16 = smov %s1746_s17 }
 0x577   : > { %s2125_s17 = smov %s2127_s21  ;;  %22 = sbr.rel (!%p20_p3) target bundleno = 6 (0x6), region = 106 }
 0x57c   :  { %1366 = vsyncpa [#allocation7], 1 }
 0x57d   :  { %1368 = vsyncpa [#allocation7 + $0x1], 1 }

// kernel: tpu_custom_call.1
= control target key start
LH: loop header
LB: loop body
LE: loop exit
PB: predicated region body
PF: predicated region fallthrough
CT: control target
= control target key end

     0   :  { %s2106_s0 = inlined_call_operand.vmem [shape: f32[4,16,32], index: 0, kind: input, shape index: {}]   ;;  %s2107_s1 = inlined_call_operand.vmem [shape: f32[4,8,32], index: 1, kind: input, shape index: {}]   ;;  %s2108_s2 = inlined_call_operand.vmem [shape: f32[1,32], index: 2, kind: input, shape index: {}]   ;;  %s2109_s3 = inlined_call_operand.vmem [shape: f32[1,32], index: 3, kind: input, shape index: {}]   ;;  %s2110_s4 = inlined_call_operand.vmem [shape: f32[1,32], index: 4, kind: input, shape index: {}]   ;;  %s2111_s5 = inlined_call_operand.vmem [shape: f32[1,32], index: 5, kind: input, shape index: {}]   ;;  %s2112_s6 = inlined_call_operand.vmem [shape: f32[32,16], index: 6, kind: input, shape index: {}]   ;;  %s2113_s7 = inlined_call_operand.vmem [shape: f32[32,16], index: 7, kind: input, shape index: {}]   ;;  %s2114_s8 = inlined_call_operand.vmem [shape: f32[32,16], index: 8, kind: input, shape index: {}]   ;;  %s2115_s9 = inlined_call_operand.vmem [shape: f32[16,32], index: 9, kind: input, shape index: {}]   ;;  %s2116_s10 = inlined_call_operand.hbm [shape: f32[4,8,32], index: 10, kind: output, shape index: {}]  }
   0x1   :  { %2117 = sst [smem:[#allocation9_spill]] %s2106_s0 }
   0x2   :  { %15 = vsyncpa [#allocation7], 0 }
   0x3   :  { %17 = vsyncpa [#allocation7 + $0x1], 0  ;;  %s1814_s13 = smov 0   ;;  %s1816_s14 = smov 0  }
   0x4   :  { %s1818_s15 = smov 0   ;;  %s1820_s16 = smov 0  }
   0x5   :  { %s1822_s17 = smov 0   ;;  %s1824_s18 = smov 0  }
   0x6 LB: > { %s1433_s19 = sadd.s32 4294967295, %s1750_s18   ;;  %s1434_s20 = sadd.s32 4294967294, %s1750_s18   ;;  %s1750_s18 = sphi %s1824_s18, %s23_s18   ;;  %s1746_s17 = sphi %s1822_s17, %s2125_s17   ;;  %s1742_s16 = sphi %s1820_s16, %s2124_s16   ;;  %s1738_s15 = sphi %s1818_s15, %s2123_s15   ;;  %s1734_s14 = sphi %s1816_s14, %s2122_s14   ;;  %s1730_s13 = sphi %s1814_s13, %s2121_s13  }
   0x7   : > { %s35_s21 = sadd.s32 1, %s1746_s17  ;;  %s264_s22 = sadd.s32 1, %s1738_s15 }
   0x8   : > { %p37_p0 = scmp.ge.s32.totalorder %s35_s21, 2  ;;  %p274_p1 = scmp.ne.s32.totalorder %s1738_s15, %s1734_s14 }
   0x9   : > { %p275_p2 = scmp.eq.s32.totalorder %s1433_s19, 1  ;;  %p280_p3 = scmp.ne.s32.totalorder %s1734_s14, %s1730_s13 }
   0xa   : > { %s2127_s21 = smov (%p37_p0, %s35_s21), 0  ;;  %p281_p5 = scmp.eq.s32.totalorder %s1434_s20, 1 }
   0xb   : > { %p1854_p4 = por %p275_p2, %p274_p1  ;;  %s261_s24 = ssub.s32 %s1746_s17, %s2127_s21 }
   0xc   : > { %p1437_p6 = scmp.ge.s32.totalorder %s1750_s18, 1  ;;  %p262_p7 = scmp.eq.s32.totalorder %s261_s24, 0 }
   0xd   : > { %p1861_p8 = por %p281_p5, %p280_p3  ;;  %p347_p9 = scmp.lt.s32.totalorder %s1750_s18, 3 }
   0xe   : > { %s1867_s26 = scalar_select %p262_p7, %s1738_s15, %s264_s22  }
   0xf   : > { %p348_p10 = pnand %p1437_p6, %p347_p9 }
  0x10   : > { %s1439_s27 = sshll.u32 (!%p348_p10), %s1742_s16, 1  ;;  %s2120_s0 = sld [smem:[#allocation9_spill]] (!%p348_p10) }
  0x11   : > { %351 = sbr.rel (%p348_p10) target bundleno = 1389 (0x56d), region = 60  ;;  %p397_p11 = scmp.lt.s32.totalorder (!%p348_p10), %s1439_s27, 3 }
  0x12   : > { %s1474_s22 = sshll.u32 (!%p348_p10), %s1742_s16, 8  ;;  %s1756_s16 = smov (!%p348_p10), [#allocation6]  }
  0x16   : > { %s2129_s27 = smov (!%p397_p11, %s1439_s27), 3  ;;  %vm420_vm0 = vcmask 261120   ;;  %v475_v24 = vld [vmem:[%s2112_s6 + $0x18] sm:$0xff]  ;;  %v474_v25 = vld [vmem:[%s2112_s6 + $0x10] sm:$0xff]  ;;  %v473_v26 = vld [vmem:[%s2112_s6 + $0x8] sm:$0xff]  ;;  %vm559_vm1 = vcmask 130048  }
  0x17   : > { %s1443_s28 = sshll.u32 %s2129_s27, 3  ;;  %s1473_s29 = sshll.u32 %s2129_s27, 4  ;;  %1513 = vmatprep.subr.mxu0 %v475_v24  ;;  %v472_v27 = vld [vmem:[%s2112_s6] sm:$0xff]  ;;  %v664_v28 = vld [vmem:[%s2113_s7 + $0x18] sm:$0xff]  ;;  %v663_v29 = vld [vmem:[%s2113_s7 + $0x10] sm:$0xff]  ;;  %vm1753_vm2 = vmmov 0  }
  0x18   : > { %s411_s12 = scalar_lea.vmem %s2107_s1, %s1443_s28  ;;  %s404_s24 = scalar_lea.vmem %s2120_s0, %s1473_s29  ;;  %1514 = vmatpush3.msra.mxu0 %v475_v24  ;;  %1524 = vmatprep.subr.mxu1 %v664_v28  ;;  %v1939_v30 = vld [vmem:[%s2114_s8 + $0x18] sm:$0xff]  ;;  %v662_v31 = vld [vmem:[%s2113_s7 + $0x8] sm:$0xff]  ;;  %v661_v32 = vld [vmem:[%s2113_s7] sm:$0xff]  ;;  %vm562_vm3 = vcmask 7168  }
  0x19   : > { %v1876_v0 = vld [vmem:[%s411_s12] sm:$0xff]  ;;  %v1878_v1 = vld [vmem:[%s404_s24 + $0x8] sm:$0xff]  ;;  %v1904_v16 = vld [vmem:[%s404_s24 + $0x18] sm:$0xff]  ;;  %1515 = vmatprep.subr.mxu0 %v474_v25  ;;  %1525 = vmatpush3.msra.mxu1 %v664_v28  ;;  %s2058_s29 = scalar_lea.hbm %s2116_s10, %s1474_s22 }
  0x1a   : > { %v1880_v2 = vld [vmem:[%s411_s12 + $0x8] sm:$0xff]  ;;  %v421_v3 = vsel %vm420_vm0, %v1876_v0, 0.0  ;;  %v577_v4 = vsel %vm420_vm0, %v1878_v1, 0.0  ;;  %v430_v5 = vmul.f32 %v1876_v0, %v1876_v0  ;;  %v1893_v9 = vld [vmem:[%s404_s24] sm:$0xff]  ;;  %v592_v12 = vmul.f32 %v1878_v1, %v1878_v1  ;;  %v1906_v17 = vld [vmem:[%s404_s24 + $0x10] sm:$0xff]  ;;  %1516 = vmatpush3.msra.mxu0 %v474_v25  ;;  %1526 = vmatprep.subr.mxu1 %v663_v29  ;;  %s392_s12 = sand.u32 1, %s1734_s14  }
  0x1b   : > { %422 = vadd.xlane.f32.xlu0 %v421_v3  ;;  %578 = vadd.xlane.f32.xlu1 %v577_v4  ;;  %v424_v6 = vsel %vm420_vm0, %v1880_v2, 0.0  ;;  %v431_v8 = vmul.f32 %v1880_v2, %v1880_v2  ;;  %v574_v11 = vsel %vm420_vm0, %v1893_v9, 0.0  ;;  %v591_v13 = vmul.f32 %v1893_v9, %v1893_v9  ;;  %s1438_s19 = sshll.u32 %s392_s12, 4  ;;  %s2061_s30 = scalar_lea.sflag [#allocation7], %s392_s12 }
  0x1c   : > { %v432_v7 = vsel %vm420_vm0, %v430_v5, 0.0  ;;  %v598_v14 = vsel %vm420_vm0, %v592_v12, 0.0  ;;  %v583_v18 = vsel %vm420_vm0, %v1904_v16, 0.0  ;;  %v580_v19 = vsel %vm420_vm0, %v1906_v17, 0.0  ;;  %1517 = vmatprep.subr.mxu0 %v473_v26  ;;  %1527 = vmatpush3.msra.mxu1 %v663_v29  ;;  %s394_s20 = scalar_lea.vmem [#allocation6], %s1438_s19  ;;  %s1678_s19 = sshll.u32 %s1756_s16, 4  ;;  %s1679_s19 = int_to_ptr.vmem [resolvable:$false] %s1678_s19 }
  0x1d   : > { %v435_v10 = vsel %vm420_vm0, %v431_v8, 0.0  ;;  %v595_v15 = vsel %vm420_vm0, %v591_v13, 0.0  ;;  %v594_v20 = vmul.f32 %v1904_v16, %v1904_v16  ;;  %v593_v21 = vmul.f32 %v1906_v17, %v1906_v17  ;;  %1518 = vmatpush3.msra.mxu0 %v473_v26  ;;  %1528 = vmatprep.subr.mxu1 %v662_v31  ;;  %s1345_s24 = sshll.u32 %s394_s20, 4  ;;  %s1680_s0 = scalar_lea.vmem %s1679_s19, 512  ;;  %s2052_s24 = int_to_ptr.vmem [resolvable:$true] %s1345_s24 }
  0x1e   : > { %1519 = vmatprep.subr.mxu0 %v472_v27  ;;  %1529 = vmatpush3.msra.mxu1 %v662_v31  ;;  %s1674_s11 = scalar_lea.vmem %s2052_s24, 256  ;;  %p1681_p1 = scmp.lt.s32.totalorder %s2052_s24, %s1679_s19 }
  0x1f   : > { %425 = vadd.xlane.f32.xlu0 %v424_v6  ;;  %433 = vadd.xlane.f32.xlu1 %v432_v7  ;;  %v604_v22 = vsel %vm420_vm0, %v594_v20, 0.0  ;;  %v601_v23 = vsel %vm420_vm0, %v593_v21, 0.0  ;;  %p1675_p12 = scmp.ne.s32.totalorder %s2052_s24, %s1674_s11  ;;  %p1682_p2 = scmp.lt.s32.totalorder %s1680_s0, %s1674_s11 }
  0x20   : > { %1520 = vmatpush3.msra.mxu0 %v472_v27  ;;  %1530 = vmatprep.subr.mxu1 %v661_v32  ;;  %v1445_v27 = vld [vmem:[%s2111_s5] ss:$0 sm:$0xff] }
  0x21   : > { %1538 = vmatprep.subr.mxu0 %v1939_v30  ;;  %1531 = vmatpush3.msra.mxu1 %v661_v32  ;;  %p1676_p13 = pnand %p1675_p12, %p1854_p4  ;;  %p1683_p3 = por %p1682_p2, %p1681_p1 }
  0x23   : > { %436 = vadd.xlane.f32.xlu1 %v435_v10  ;;  %575 = vadd.xlane.f32.xlu0 %v574_v11  ;;  %p1677_p0 = pneg %p1676_p13 }
  0x25   : > { %p1684_p5 = pnand %p1683_p3, %p1677_p0 }
  0x27   : > { %599 = vadd.xlane.f32.xlu1 %v598_v14  ;;  %596 = vadd.xlane.f32.xlu0 %v595_v15 }
  0x2b   : > { %584 = vadd.xlane.f32.xlu1 %v583_v18  ;;  %581 = vadd.xlane.f32.xlu0 %v580_v19 }
  0x2f   : > { %605 = vadd.xlane.f32.xlu1 %v604_v22  ;;  %602 = vadd.xlane.f32.xlu0 %v601_v23  ;;  %v1444_v23 = vld [vmem:[%s2110_s4] ss:$0 sm:$0xff] }
  0xa4   : > { %v423_v33 = vpop.xlane.xlu0 %422  ;;  %v579_v34 = vpop.xlane.xlu1 %578 }
  0xa5   : > { %v428_v35 = vmul.f32 0.03125, %v423_v33  ;;  %v1948_v42 = vmul.f32 0.03125, %v579_v34 }
  0xa7   : > { %v440_v38 = vmul.f32 %v428_v35, %v428_v35  ;;  %v612_v51 = vmul.f32 %v1948_v42, %v1948_v42  ;;  %v446_v19 = vsub.f32 %v1876_v0, %v428_v35  ;;  %v624_v33 = vsub.f32 %v1878_v1, %v1948_v42  ;;  %v1449_v1 = vld [vmem:[%s2109_s3] ss:$0 sm:$0xff] }
  0xa8   : > { %v426_v36 = vpop.xlane.xlu0 %425  ;;  %v434_v37 = vpop.xlane.xlu1 %433 }
  0xa9   : > { %v429_v39 = vmul.f32 0.03125, %v426_v36  ;;  %v438_v40 = vmul.f32 0.03125, %v434_v37  ;;  %v1448_v37 = vld [vmem:[%s2108_s2] ss:$0 sm:$0xff] }
  0xab   : > { %v442_v41 = vsub.f32 %v438_v40, %v440_v38  ;;  %v441_v45 = vmul.f32 %v429_v39, %v429_v39  ;;  %v447_v28 = vsub.f32 %v1880_v2, %v429_v39  ;;  %v764_v40 = vld [vmem:[%s2114_s8 + $0x10] sm:$0xff] }
  0xac   : > { %v437_v43 = vpop.xlane.xlu1 %436  ;;  %v576_v44 = vpop.xlane.xlu0 %575 }
  0xad   : > { %v444_v46 = vmax.f32 %v442_v41, 0.0  ;;  %v439_v47 = vmul.f32 0.03125, %v437_v43  ;;  %v587_v48 = vmul.f32 0.03125, %v576_v44 }
  0xaf   : > { %v448_v49 = vadd.f32 1e-05, %v444_v46  ;;  %v443_v50 = vsub.f32 %v439_v47, %v441_v45  ;;  %v611_v52 = vmul.f32 %v587_v48, %v587_v48  ;;  %v623_v36 = vsub.f32 %v1893_v9, %v587_v48  ;;  %v763_v9 = vld [vmem:[%s2114_s8 + $0x8] sm:$0xff]  ;;  %v762_v47 = vld [vmem:[%s2114_s8] sm:$0xff] }
  0xb0   : > { %v600_v53 = vpop.xlane.xlu1 %599  ;;  %v597_v54 = vpop.xlane.xlu0 %596 }
  0xb1   : > { %1650 = vrsqrt.f32 %v448_v49  ;;  %v445_v55 = vmax.f32 %v443_v50, 0.0  ;;  %v608_v56 = vmul.f32 0.03125, %v600_v53  ;;  %v607_v57 = vmul.f32 0.03125, %v597_v54 }
  0xb3   : > { %v449_v58 = vadd.f32 1e-05, %v445_v55  ;;  %v616_v59 = vsub.f32 %v608_v56, %v612_v51  ;;  %v615_v60 = vsub.f32 %v607_v57, %v611_v52 }
  0xb4   : > { %v585_v61 = vpop.xlane.xlu1 %584  ;;  %v582_v62 = vpop.xlane.xlu0 %581 }
  0xb5   : > { %1652 = vrsqrt.f32 %v449_v58  ;;  %v620_v63 = vmax.f32 %v616_v59, 0.0  ;;  %v619_v3 = vmax.f32 %v615_v60, 0.0  ;;  %v590_v4 = vmul.f32 0.03125, %v585_v61 }
  0xb6   : > { %v1952_v5 = vmul.f32 0.03125, %v582_v62 }
  0xb7   : > { %v628_v6 = vadd.f32 1e-05, %v620_v63  ;;  %v627_v7 = vadd.f32 1e-05, %v619_v3  ;;  %v614_v8 = vmul.f32 %v590_v4, %v590_v4  ;;  %v626_v46 = vsub.f32 %v1904_v16, %v590_v4 }
  0xb8   : > { %v606_v10 = vpop.xlane.xlu1 %605  ;;  %v603_v11 = vpop.xlane.xlu0 %602  ;;  %v613_v12 = vmul.f32 %v1952_v5, %v1952_v5 }
  0xb9   : > { %1654 = vrsqrt.f32 %v628_v6  ;;  %v610_v13 = vmul.f32 0.03125, %v606_v10  ;;  %v609_v14 = vmul.f32 0.03125, %v603_v11  ;;  %v1754_v6 = vmov -inf  }
  0xba   : > { %1656 = vrsqrt.f32 %v627_v7  ;;  %563 = vst.msk [vmem:[#allocation3] sm:$0xff] %vm562_vm3, %v1754_v6  ;;  %564 = vst.msk [vmem:[#allocation3 + $0x8] sm:$0xff] %vm562_vm3, %v1754_v6 }
  0xbb   : > { %v618_v15 = vsub.f32 %v610_v13, %v614_v8  ;;  %v617_v18 = vsub.f32 %v609_v14, %v613_v12 }
  0xbd   : > { %v622_v20 = vmax.f32 %v618_v15, 0.0  ;;  %v621_v21 = vmax.f32 %v617_v18, 0.0  ;;  %v1755_v18 = vmov 0  }
  0xbe   : > { %v1651_v22 = vpop.eup %1650  ;;  %1648 = vset.pattern.permute.xlu0 %v1755_v18  ;;  %1649 = vset.pattern.permute.xlu1 %v1755_v18 }
  0xbf   : > { %v630_v24 = vadd.f32 1e-05, %v622_v20  ;;  %v629_v25 = vadd.f32 1e-05, %v621_v21  ;;  %v452_v26 = vmul.f32 %v1651_v22, %v446_v19 }
  0xc1   : > { %1658 = vrsqrt.f32 %v630_v24  ;;  %v461_v29 = vmul.f32 %v1444_v23, %v452_v26  ;;  %v1012_v19 = vld [vmem:[#allocation3] sm:$0xff] }
  0xc2   : > { %v1653_v31 = vpop.eup %1652  ;;  %1660 = vrsqrt.f32 %v629_v25 }
  0xc3   : > { %v453_v0 = vmul.f32 %v1653_v31, %v447_v28  ;;  %v470_v32 = vadd.f32 %v1445_v27, %v461_v29 }
  0xc5   : > { %v462_v34 = vmul.f32 %v1444_v23, %v453_v0  ;;  %1521 = vmatprep.mubr.msk.f32.mxu0 %vm420_vm0, %v470_v32  ;;  %v1013_v23 = vld [vmem:[#allocation3 + $0x8] sm:$0xff] }
  0xc6   : > { %v1655_v35 = vpop.eup %1654 }
  0xc7   : > { %v1657_v2 = vpop.eup %1656  ;;  %v471_v38 = vadd.f32 %v1445_v27, %v462_v34  ;;  %v636_v39 = vmul.f32 %v1655_v35, %v624_v33 }
  0xc8   : > { %v635_v41 = vmul.f32 %v1657_v2, %v623_v36 }
  0xc9   : > { %1522 = vmatmul.mubr.msk.f32.vlgmr.msra.gmra.mxu0 %vm420_vm0, %v471_v38  ;;  %v647_v42 = vmul.f32 %v1448_v37, %v636_v39 }
  0xca   : > { %1539 = vmatpush3.msra.mxu0 %v1939_v30  ;;  %v646_v43 = vmul.f32 %v1448_v37, %v635_v41  ;;  %v625_v30 = vsub.f32 %v1906_v17, %v1952_v5  ;;  %v1752_v17 = vmov 0.0  }
  0xcb   : > { %1540 = vmatprep.subr.mxu0 %v764_v40  ;;  %v658_v44 = vadd.f32 %v1449_v1, %v647_v42  ;;  %1552 = vmatprep.subr.mxu1 %v1752_v17  ;;  %567 = vst.msk [vmem:[#allocation5] sm:$0xff] %vm559_vm1, %v1752_v17  ;;  %568 = vst.msk [vmem:[#allocation5 + $0x8] sm:$0xff] %vm559_vm1, %v1752_v17 }
  0xcc   : > { %1541 = vmatpush3.msra.mxu0 %v764_v40  ;;  %v657_v45 = vadd.f32 %v1449_v1, %v646_v43  ;;  %565 = vst.msk [vmem:[#allocation4] sm:$0xff] %vm562_vm3, %v1752_v17  ;;  %566 = vst.msk [vmem:[#allocation4 + $0x8] sm:$0xff] %vm562_vm3, %v1752_v17 }
  0xcd   : > { %1542 = vmatprep.subr.mxu0 %v763_v9 }
  0xce   : > { %v1659_v48 = vpop.eup %1658  ;;  %1532 = vmatprep.mubr.msk.f32.mxu1 %vm420_vm0, %v657_v45  ;;  %1543 = vmatpush3.msra.mxu0 %v763_v9 }
  0xcf   : > { %v1661_v49 = vpop.eup %1660  ;;  %1546 = vmatprep.mubr.msk.f32.mxu0 %vm420_vm0, %v657_v45  ;;  %1533 = vmatmul.mubr.msk.f32.vlgmr.msra.gmra.mxu1 %vm420_vm0, %v658_v44  ;;  %v638_v50 = vmul.f32 %v1659_v48, %v626_v46  ;;  %v1247_v48 = vld [vmem:[%s2115_s9 + $0x8] sm:$0xff] }
  0xd0   : > { %1544 = vmatprep.subr.mxu0 %v762_v47  ;;  %v637_v16 = vmul.f32 %v1661_v49, %v625_v30  ;;  %v1246_v49 = vld [vmem:[%s2115_s9] sm:$0xff] }
  0xd1   : > { %1545 = vmatpush3.msra.mxu0 %v762_v47  ;;  %v649_v51 = vmul.f32 %v1448_v37, %v638_v50 }
  0xd2   : > { %1547 = vmatmul.mubr.msk.f32.vlgmr.msra.gmra.mxu0 %vm420_vm0, %v658_v44  ;;  %v648_v52 = vmul.f32 %v1448_v37, %v637_v16  ;;  %1559 = vmatprep.subr.mxu0 %v1752_v17  ;;  %v1059_v16 = vld [vmem:[#allocation5] sm:$0xff] }
  0xd3   : > { %v660_v53 = vadd.f32 %v1449_v1, %v649_v51  ;;  %v1044_v40 = vld [vmem:[#allocation4] sm:$0xff]  ;;  %v1045_v9 = vld [vmem:[#allocation4 + $0x8] sm:$0xff] }
  0xd4   : > { %v659_v54 = vadd.f32 %v1449_v1, %v648_v52 }
  0xd6   : > { %1535 = vmatprep.mubr.msk.f32.mxu1 %vm420_vm0, %v659_v54  ;;  %1549 = vmatprep.mubr.msk.f32.mxu0 %vm420_vm0, %v659_v54 }
  0xd7   : > { %1536 = vmatmul.mubr.msk.f32.gmra.mxu1 %vm420_vm0, %v660_v53  ;;  %1550 = vmatmul.mubr.msk.f32.gmra.mxu0 %vm420_vm0, %v660_v53 }
  0xd8   : > { %1556 = vmatprep.mubr.msk.f32.mxu1 %vm1753_vm2, %v1752_v17  ;;  %1563 = vmatprep.mubr.msk.f32.mxu0 %vm1753_vm2, %v1752_v17 }
 0x189   : > { %v1523_v55 = vpop.f32.mrf.mxu0 }
 0x18a   : > { %v558_v56 = vmul.f32 0.25, %v1523_v55  ;;  %v1060_v55 = vld [vmem:[#allocation5 + $0x8] sm:$0xff] }
 0x18b   : > { %v548_v57 = vpop.f32.mrf.mxu0 }
 0x18c   : > { %561 = vst.msk [vmem:[#allocation2 + $0x8] sm:$0xff] %vm559_vm1, %v558_v56  ;;  %v557_v58 = vmul.f32 0.25, %v548_v57 }
 0x18e   : > { %560 = vst.msk [vmem:[#allocation2] sm:$0xff] %vm559_vm1, %v557_v58 }
 0x18f   : > { %v1534_v59 = vpop.f32.mrf.mxu1 }
 0x190   : > { %1553 = vmatpush3.xpose.msk.msra.mxu1 %vm559_vm1, %v1534_v59 }
 0x191   : > { %1554 = vmatprep.subr.mxu1 %v1752_v17  ;;  %v743_v60 = vpop.f32.mrf.mxu1 }
 0x192   : > { %v1548_v61 = vpop.f32.mrf.mxu0 }
 0x193   : > { %v852_v5 = vld [vmem:[#allocation2 + $0x8] sm:$0xff] }
 0x194   : > { %1555 = vmatpush3.xpose.msk.msra.mxu1 %vm559_vm1, %v743_v60  ;;  %v832_v3 = vpop.f32.mrf.mxu0 }
 0x195   : > { %v851_v62 = vld [vmem:[#allocation2] sm:$0xff]  ;;  %1566 = vmatprep.subr.mxu1 %v1752_v17 }
 0x197   : > { %v1537_v63 = vpop.f32.mrf.mxu1  ;;  %1557 = vmatmul.mubr.msk.f32.vlgmr.msra.gmra.mxu1 %vm559_vm1, %v851_v62  ;;  %v1551_v10 = vpop.f32.mrf.mxu0 }
 0x198   : > { %1560 = vmatpush3.xpose.msk.msra.mxu0 %vm559_vm1, %v1537_v63  ;;  %1567 = vmatpush3.msra.mxu1 %v1548_v61 }
 0x199   : > { %1568 = vmatprep.subr.mxu1 %v1752_v17  ;;  %1561 = vmatprep.subr.mxu0 %v1752_v17  ;;  %v753_v4 = vpop.f32.mrf.mxu1  ;;  %v842_v12 = vpop.f32.mrf.mxu0 }
 0x19a   : > { %1569 = vmatpush3.msra.mxu1 %v832_v3  ;;  %1570 = vmatprep.mubr.msk.f32.mxu1 %vm1753_vm2, %v1752_v17 }
 0x19b   : > { %1573 = vmatprep.subr.mxu1 %v1752_v17 }
 0x19c   : > { %1562 = vmatpush3.xpose.msk.msra.mxu0 %vm559_vm1, %v753_v4 }
 0x19d   : > { %1580 = vmatprep.subr.mxu0 %v1247_v48 }
 0x19f   : > { %1564 = vmatmul.mubr.msk.f32.vlgmr.msra.gmra.mxu0 %vm559_vm1, %v852_v5 }
 0x1a0   : > { %1581 = vmatpush3.msra.mxu0 %v1247_v48 }
 0x1a1   : > { %1582 = vmatprep.subr.mxu0 %v1246_v49 }
 0x1a2   : > { %1583 = vmatpush3.msra.mxu0 %v1246_v49 }
 0x257   : > { %v929_v7 = vpop.f32.mrf.mxu1 }
 0x258   : > { %v1014_v8 = vsel %vm559_vm1, %v929_v7, -inf }
 0x259   : > { %1015 = vmax.xlane.f32.xlu0 %v1014_v8  ;;  %v1558_v11 = vpop.f32.mrf.mxu1 }
 0x25f   : > { %v1008_v13 = vpop.f32.mrf.mxu0 }
 0x260   : > { %v1017_v14 = vsel %vm559_vm1, %v1008_v13, -inf }
 0x261   : > { %1018 = vmax.xlane.f32.xlu1 %v1017_v14  ;;  %v1565_v15 = vpop.f32.mrf.mxu0 }
 0x2e2   : > { %v1016_v20 = vpop.xlane.xlu0 %1015 }
 0x2e3   : > { %v1020_v21 = vmax.f32 %v1012_v19, %v1016_v20 }
 0x2e5   : > { %v1022_v22 = vsub.f32 %v1012_v19, %v1020_v21  ;;  %1223 = vst.msk [vmem:[#allocation3] sm:$0xff] %vm562_vm3, %v1020_v21  ;;  %1030 = vperm.xlu0 %1648, %v1020_v21  }
 0x2e7   : > { %v1024_v34 = vmul.f32 1.442695, %v1022_v22 }
 0x2ea   : > { %v1019_v24 = vpop.xlane.xlu1 %1018 }
 0x2eb   : > { %v1021_v25 = vmax.f32 %v1013_v23, %v1019_v24 }
 0x2ed   : > { %v1023_v26 = vsub.f32 %v1013_v23, %v1021_v25  ;;  %1224 = vst.msk [vmem:[#allocation3 + $0x8] sm:$0xff] %vm562_vm3, %v1021_v25  ;;  %1035 = vperm.xlu1 %1649, %v1021_v25  }
 0x2ef   : > { %v1026_v36 = vmul.f32 1.442695, %v1023_v26 }
 0x360   : > { %v1031_v27 = vpop.permute.xlu0 %1030 }
 0x361   : > { %v1038_v28 = vsub.f32 %v929_v7, %v1031_v27 }
 0x363   : > { %v1040_v29 = vmul.f32 1.442695, %v1038_v28 }
 0x365   : > { %1662 = vpow2.f32 %v1040_v29 }
 0x368   : > { %v1036_v31 = vpop.permute.xlu1 %1035 }
 0x369   : > { %v1039_v0 = vsub.f32 %v1008_v13, %v1036_v31 }
 0x36b   : > { %v1042_v32 = vmul.f32 1.442695, %v1039_v0 }
 0x36d   : > { %1664 = vpow2.f32 %v1042_v32 }
 0x36e   : > { %1666 = vpow2.f32 %v1024_v34 }
 0x36f   : > { %1668 = vpow2.f32 %v1026_v36 }
 0x372   : > { %v1663_v33 = vpop.eup %1662 }
 0x373   : > { %1571 = vmatmul.mubr.msk.f32.vlgmr.msra.gmra.mxu1 %vm559_vm1, %v1663_v33  ;;  %v1048_v35 = vsel %vm559_vm1, %v1663_v33, 0.0 }
 0x374   : > { %1574 = vmatpush3.msra.mxu1 %v1551_v10  ;;  %1049 = vadd.xlane.f32.xlu1 %v1048_v35 }
 0x375   : > { %1575 = vmatprep.subr.mxu1 %v1752_v17  ;;  %1577 = vmatprep.mubr.msk.f32.mxu1 %vm1753_vm2, %v1752_v17 }
 0x376   : > { %1576 = vmatpush3.msra.mxu1 %v842_v12 }
 0x37a   : > { %v1665_v37 = vpop.eup %1664 }
 0x37b   : > { %1578 = vmatmul.mubr.msk.f32.vlgmr.msra.gmra.mxu1 %vm559_vm1, %v1665_v37  ;;  %v1051_v2 = vsel %vm559_vm1, %v1665_v37, 0.0  ;;  %v1667_v38 = vpop.eup %1666 }
 0x37c   : > { %1052 = vadd.xlane.f32.xlu0 %v1051_v2  ;;  %v1669_v39 = vpop.eup %1668  ;;  %v1046_v41 = vmul.f32 %v1667_v38, %v1044_v40 }
 0x37d   : > { %v1047_v43 = vmul.f32 %v1669_v39, %v1045_v9 }
 0x385   : > { %1063 = vperm.xlu1 %1649, %v1667_v38  }
 0x389   : > { %1068 = vperm.xlu1 %1649, %v1669_v39  }
 0x3fd   : > { %v1050_v1 = vpop.xlane.xlu1 %1049 }
 0x3fe   : > { %v1054_v42 = vadd.f32 %v1050_v1, %v1046_v41 }
 0x400   : > { %1057 = vst.msk [vmem:[#allocation4] sm:$0xff] %vm562_vm3, %v1054_v42 }
 0x401   : > { %v1064_v51 = vpop.permute.xlu1 %1063 }
 0x402   : > { %v1071_v52 = vmul.f32 %v1064_v51, %v1059_v16 }
 0x405   : > { %v1053_v44 = vpop.xlane.xlu0 %1052  ;;  %v1069_v56 = vpop.permute.xlu1 %1068 }
 0x406   : > { %v1055_v45 = vadd.f32 %v1053_v44, %v1047_v43  ;;  %v1072_v57 = vmul.f32 %v1069_v56, %v1060_v55 }
 0x407   : > { %v1230_v46 = vld [vmem:[#allocation4] sm:$0xff] }
 0x408   : > { %1058 = vst.msk [vmem:[#allocation4 + $0x8] sm:$0xff] %vm562_vm3, %v1055_v45  ;;  %1670 = vrcp.f32 %v1230_v46 }
 0x40f   : > { %v1231_v47 = vld [vmem:[#allocation4 + $0x8] sm:$0xff] }
 0x410   : > { %1672 = vrcp.f32 %v1231_v47 }
 0x415   : > { %v1671_v30 = vpop.eup %1670 }
 0x416   : > { %1236 = vperm.xlu1 %1649, %v1671_v30  }
 0x41d   : > { %v1673_v50 = vpop.eup %1672 }
 0x41e   : > { %1241 = vperm.xlu0 %1648, %v1673_v50  }
 0x433   : > { %v1142_v53 = vpop.f32.mrf.mxu1 }
 0x434   : > { %v1219_v54 = vadd.f32 %v1142_v53, %v1071_v52 }
 0x435   : > { %v1572_v17 = vpop.f32.mrf.mxu1 }
 0x436   : > { %1221 = vst.msk [vmem:[#allocation5] sm:$0xff] %vm559_vm1, %v1219_v54 }
 0x43b   : > { %v1215_v58 = vpop.f32.mrf.mxu1 }
 0x43c   : > { %v1220_v59 = vadd.f32 %v1215_v58, %v1072_v57 }
 0x43d   : > { %v1579_v60 = vpop.f32.mrf.mxu1  ;;  %v1228_v62 = vld [vmem:[#allocation5] sm:$0xff] }
 0x43e   : > { %1222 = vst.msk [vmem:[#allocation5 + $0x8] sm:$0xff] %vm559_vm1, %v1220_v59 }
 0x445   : > { %v1229_v4 = vld [vmem:[#allocation5 + $0x8] sm:$0xff] }
 0x491   : > { %v1237_v61 = vpop.permute.xlu1 %1236 }
 0x492   : > { %v1244_v63 = vmul.f32 %v1237_v61, %v1228_v62 }
 0x494   : > { %1584 = vmatprep.mubr.msk.f32.mxu0 %vm559_vm1, %v1244_v63 }
 0x499   : > { %v1242_v3 = vpop.permute.xlu0 %1241 }
 0x49a   : > { %v1245_v5 = vmul.f32 %v1242_v3, %v1229_v4 }
 0x49c   : > { %1585 = vmatmul.mubr.msk.f32.vlgmr.msra.gmra.mxu0 %vm559_vm1, %v1245_v5 }
 0x55c   : > { %v1586_v6 = vpop.f32.mrf.mxu0 }
 0x55d   : > { %1330 = vst.msk [vmem:[%s394_s20 + $0x8] sm:$0xff] %vm420_vm0, %v1586_v6 }
 0x55e   : > { %v1320_v7 = vpop.f32.mrf.mxu0 }
 0x55f   : > { %1329 = vst.msk [vmem:[%s394_s20] sm:$0xff] %vm420_vm0, %v1320_v7 }
 0x560   : > { %1687 = shalt.err (!%p1684_p5)
}
 0x561   : > { %s1688_s12 = scalar_lea.hbm %s2058_s29, 256  ;;  %s1692_s27 = scalar_lea.hbm %s2116_s10, 512 }
 0x562   : > { %p1689_p6 = scmp.ne.s32.totalorder %s2058_s29, %s1688_s12  ;;  %p1693_p10 = scmp.lt.s32.totalorder %s2058_s29, %s2116_s10 }
 0x563   : > { %p1694_p11 = scmp.lt.s32.totalorder %s1692_s27, %s1688_s12 }
 0x564   : > { %p1690_p7 = pnand %p1689_p6, %p1854_p4 }
 0x565   : > { %p1695_p12 = por %p1694_p11, %p1693_p10 }
 0x566   : > { %p1691_p9 = pneg %p1690_p7 }
 0x568   : > { %p1696_p13 = pnand %p1695_p12, %p1691_p9 }
 0x56a   : > { %1699 = shalt.err (!%p1696_p13)
}
 0x56b   : > { %s1757_s0 = smov 128   ;;  %s1758_s11 = smov 8  }
 0x56c   : > { %1587 = dma.vmem_to_hbm [thread:$0]  (%p1854_p4), %s2052_s24, 256, %s2058_s29, %s2061_s30, %s1757_s0, %s1757_s0, %s1758_s11  }
 0x56d PF: > { %p1593_p0 = scmp.ge.s32.totalorder %s1750_s18, 2  ;;  %s1360_s19 = sand.u32 1, %s1730_s13  }
 0x56e   : > { %s1361_s12 = scalar_lea.sflag [#allocation7], %s1360_s19 }
 0x56f   : > { %p1590_p1 = pnand %p1593_p0, %p1861_p8 }
 0x571   : > { %p1591_p2 = pneg %p1590_p1 }
 0x573   : > { %1725 = dma.done.wait (%p1591_p2), %s1361_s12, 256  }
 0x574   : > { %1727 = vsyncadd (%p1591_p2), %s1361_s12, 4294967040  ;;  %s23_s18 = sadd.s32 1, %s1750_s18   ;;  %s2121_s13 = smov %s1734_s14 }
 0x575   : > { %p20_p3 = scmp.ge.s32.totalorder %s23_s18, 4   ;;  %s2122_s14 = smov %s1738_s15 }
 0x576   : > { %s2123_s15 = smov %s1867_s26  ;;  %s2124_s16 = smov %s1746_s17 }
 0x577   : > { %s2125_s17 = smov %s2127_s21  ;;  %22 = sbr.rel (!%p20_p3) target bundleno = 6 (0x6), region = 106 }
 0x57c   :  { %1366 = vsyncpa [#allocation7], 1 }
 0x57d   :  { %1368 = vsyncpa [#allocation7 + $0x1], 1 }

</bundles_post_ra>
